<compile_context>
chip_gen: v6e
topology: v6e:2x2x1
jax: 0.10.0
libtpu: 0.0.40
codegen_flags: <defaults>
</compile_context>

<pallas_src>
import jax
import jax.numpy as jnp
from jax import lax
from jax.experimental import pallas as pl
from jax.experimental.pallas import tpu as pltpu

FC1_PAD = 256   # fc1: 200 -> 256 output lanes (zero-padded, exact)
FC2_PAD = 128   # fc2: 100 -> 128 output lanes (zero-padded, exact)


def _predict(state_ref, act_ref, w_rnn_ref, b_ref,
             fc1_w_ref, fc1_b_ref, fc2_w_ref, fc2_b_ref,
             fc3_w_ref, fc3_b_ref):
    """LSTM over time + MLP head; returns pred [B, S] in f32."""
    B, T, S = state_ref.shape
    H = w_rnn_ref.shape[1] // 4

    w_rnn = w_rnn_ref[...]
    w_ih = w_rnn[:S]                                        # [S, 4H]
    w_hh = w_rnn[S:]                                        # [H, 4H]

    # Hoisted input projection: one MXU call for all (b, t), bias folded in.
    # Stack per-batch [T, S] slabs along the sublane axis (tile-aligned concat).
    x_all = jnp.concatenate([state_ref[b] for b in range(B)], axis=0)   # [B*T, S]
    gx = (jnp.dot(x_all, w_ih, preferred_element_type=jnp.float32)
          + b_ref[...])                                     # [B*T, 4H]
    gx_b = [gx[b * T:(b + 1) * T, :] for b in range(B)]     # B x [T, 4H] views

    h = jnp.zeros((B, H), jnp.float32)
    c = jnp.zeros((B, H), jnp.float32)
    # Fully unrolled recurrence (T static): only h @ W_hh + elementwise gate
    # math remain on the serial critical path.
    for t in range(T):
        gx_t = jnp.concatenate([g[t:t + 1, :] for g in gx_b], axis=0)   # [B, 4H]
        gates = gx_t + jnp.dot(h, w_hh, preferred_element_type=jnp.float32)
        # PyTorch LSTM gate order: input, forget, cell(g), output.
        i_g = jax.nn.sigmoid(gates[:, 0 * H:1 * H])
        f_g = jax.nn.sigmoid(gates[:, 1 * H:2 * H])
        g_g = jnp.tanh(gates[:, 2 * H:3 * H])
        o_g = jax.nn.sigmoid(gates[:, 3 * H:4 * H])
        c = f_g * c + i_g * g_g
        h = o_g * jnp.tanh(c)                               # h == out[:, t]

    a = act_ref[...][:, -1, :]                              # action[:, -1]  [B, A]
    fc1_w = fc1_w_ref[...]
    # concat([h, a]) @ fc1_w  ==  h @ fc1_w[:H] + a @ fc1_w[H:]  (no concat relayout)
    x1 = jnp.maximum(
        jnp.dot(h, fc1_w[:H], preferred_element_type=jnp.float32)
        + jnp.dot(a, fc1_w[H:], preferred_element_type=jnp.float32)
        + fc1_b_ref[...], 0.0)
    x2 = jnp.maximum(
        jnp.dot(x1, fc2_w_ref[...], preferred_element_type=jnp.float32)
        + fc2_b_ref[...], 0.0)
    return (jnp.dot(x2, fc3_w_ref[...], preferred_element_type=jnp.float32)
            + fc3_b_ref[...])                               # [B, S]


def sysmodel_single_kernel(state_ref, act_ref, w_rnn_ref, b_ref,
                           fc1_w_ref, fc1_b_ref, fc2_w_ref, fc2_b_ref,
                           fc3_w_ref, fc3_b_ref, out_ref):
    pred = _predict(state_ref, act_ref, w_rnn_ref, b_ref,
                    fc1_w_ref, fc1_b_ref, fc2_w_ref, fc2_b_ref,
                    fc3_w_ref, fc3_b_ref)
    out_ref[...] = pred.astype(out_ref.dtype)


def sysmodel_scatter_kernel(ts_ref, state_ref, act_ref, w_rnn_ref, b_ref,
                            fc1_w_ref, fc1_b_ref, fc2_w_ref, fc2_b_ref,
                            fc3_w_ref, fc3_b_ref, out_ref):
    B, T, S = state_ref.shape
    pred = _predict(state_ref, act_ref, w_rnn_ref, b_ref,
                    fc1_w_ref, fc1_b_ref, fc2_w_ref, fc2_b_ref,
                    fc3_w_ref, fc3_b_ref).astype(out_ref.dtype)
    # Fused "clone(state); out[i, t_i+1] = pred[i] if t_i+1 < T":
    # vectorized per-batch blend (iota / compare / select) -- no dynamic
    # sublane stores, no wrapper one-hot. B is small and static.
    row = lax.broadcasted_iota(jnp.int32, (T, S), 0)
    for i in range(B):
        t_next = ts_ref[i] + 1                              # scalar from SMEM
        hit = jnp.logical_and(row == t_next, t_next < T)    # [T, S] bool
        out_ref[i, :, :] = jnp.where(hit, pred[i:i + 1, :], state_ref[i, :, :])


def sysmodel_forward(params, state, action, timesteps=None, single=False):
    """state: [B, T, S]; action: [B, Ta, A]; timesteps: [B] int (single=False)."""
    B, T, S = state.shape
    state = state.astype(jnp.float32)
    action = action.astype(jnp.float32)

    weights = (params["w_rnn"], params["b"],
               params["fc1_w"], params["fc1_b"],
               params["fc2_w"], params["fc2_b"],
               params["fc3_w"], params["fc3_b"])
    vmem = pl.BlockSpec(memory_space=pltpu.MemorySpace.VMEM)
    smem = pl.BlockSpec(memory_space=pltpu.MemorySpace.SMEM)

    if single:
        return pl.pallas_call(
            sysmodel_single_kernel,
            out_shape=jax.ShapeDtypeStruct((B, S), jnp.float32),
            in_specs=[vmem] * (2 + len(weights)),
            out_specs=vmem,
        )(state, action, *weights)

    if timesteps is None:
        raise ValueError("timesteps must be provided when single=False")
    ts = jnp.asarray(timesteps, dtype=jnp.int32)
    return pl.pallas_call(
        sysmodel_scatter_kernel,
        out_shape=jax.ShapeDtypeStruct((B, T, S), jnp.float32),
        in_specs=[smem] + [vmem] * (2 + len(weights)),
        out_specs=vmem,
        # state (operand index 1) feeds the cloned output buffer (P8 aliasing).
        input_output_aliases={1: 0},
    )(ts, state, action, *weights)


def make_params(key, state_size, action_size, hidden_size):
    """Random parameters laid out for the kernel.

    Mapping from the PyTorch module:
      w_rnn = concat([weight_ih_l0.T, weight_hh_l0.T], 0)          [(S+H), 4H]
      b     = (bias_ih_l0 + bias_hh_l0)[None, :]   (bias_hh filled with -0.2)
      fc*_w = fc*.weight.T ; fc*_b = fc*.bias[None, :]
      fc1/fc2 widths zero-padded 200->256 and 100->128 (numerically exact).
    """
    ks = jax.random.split(key, 9)

    def init(k, shape, scale=0.1):
        return scale * jax.random.normal(k, shape, dtype=jnp.float32)

    S, A, H = state_size, action_size, hidden_size
    w_ih = init(ks[0], (S, 4 * H))
    w_hh = init(ks[1], (H, 4 * H))
    b_ih = init(ks[2], (1, 4 * H))
    b_hh = jnp.full((1, 4 * H), -0.2, jnp.float32)      # .data.fill_(-0.2)

    fc1_w = init(ks[3], (H + A, 200)); fc1_b = init(ks[4], (1, 200))
    fc2_w = init(ks[5], (200, 100));   fc2_b = init(ks[6], (1, 100))
    fc3_w = init(ks[7], (100, S));     fc3_b = init(ks[8], (1, S))

    return dict(
        w_rnn=jnp.concatenate([w_ih, w_hh], axis=0),
        b=b_ih + b_hh,
        fc1_w=jnp.pad(fc1_w, ((0, 0), (0, FC1_PAD - 200))),
        fc1_b=jnp.pad(fc1_b, ((0, 0), (0, FC1_PAD - 200))),
        fc2_w=jnp.pad(fc2_w, ((0, FC1_PAD - 200), (0, FC2_PAD - 100))),
        fc2_b=jnp.pad(fc2_b, ((0, 0), (0, FC2_PAD - 100))),
        fc3_w=jnp.pad(fc3_w, ((0, FC2_PAD - 100), (0, 0))),
        fc3_b=fc3_b,
    )


if __name__ == "__main__":
    B, T, S, A, H = 2, 8, 8, 4, 32

    key = jax.random.PRNGKey(0)
    k_p, k_s, k_a = jax.random.split(key, 3)
    params = make_params(k_p, S, A, H)

    state = jax.random.normal(k_s, (B, T, S), dtype=jnp.float32)
    action = jax.random.normal(k_a, (B, T, A), dtype=jnp.float32)
    # batch 0 writes into row 4; batch 1 has t+1 == T and is (correctly) skipped
    timesteps = jnp.array([3, T - 1], dtype=jnp.int32)

    out = sysmodel_forward(params, state, action, timesteps=timesteps, single=False)
    out_single = sysmodel_forward(params, state, action, single=True)
    jax.block_until_ready((out, out_single))

    assert out.shape == (B, T, S)
    assert out_single.shape == (B, S)
    # scatter semantics: untouched rows equal the cloned state, touched row == pred
    assert bool(jnp.allclose(out[1], state[1]))                     # t+1 == T skipped
    assert bool(jnp.allclose(out[0, :4], state[0, :4]))
    assert bool(jnp.allclose(out[0, 5:], state[0, 5:]))
    assert bool(jnp.allclose(out[0, 4], out_single[0], atol=1e-5))
    print("KERNEL_OK")
</pallas_src>

<mosaic_0001>
module attributes {stable_mosaic.version = 11 : i64} {
  func.func @sysmodel_scatter_kernel(%arg0: memref<2xi32, #tpu.memory_space<smem>>, %arg1: memref<2x8x8xf32, #tpu.memory_space<vmem>>, %arg2: memref<2x8x4xf32, #tpu.memory_space<vmem>>, %arg3: memref<40x128xf32, #tpu.memory_space<vmem>>, %arg4: memref<1x128xf32, #tpu.memory_space<vmem>>, %arg5: memref<36x256xf32, #tpu.memory_space<vmem>>, %arg6: memref<1x256xf32, #tpu.memory_space<vmem>>, %arg7: memref<256x128xf32, #tpu.memory_space<vmem>>, %arg8: memref<1x128xf32, #tpu.memory_space<vmem>>, %arg9: memref<128x8xf32, #tpu.memory_space<vmem>>, %arg10: memref<1x8xf32, #tpu.memory_space<vmem>>, %arg11: memref<2x8x8xf32, #tpu.memory_space<vmem>>) attributes {dimension_semantics = [], scalar_prefetch = 0 : i64, scratch_operands = 0 : i64, tpu.core_type = #tpu.core_type<tc>} {
    %c0 = arith.constant 0 : index
    %c0_0 = arith.constant 0 : index
    %0 = vector.load %arg3[%c0, %c0_0] : memref<40x128xf32, #tpu.memory_space<vmem>>, vector<40x128xf32>
    %1 = vector.extract_strided_slice %0 {offsets = [0, 0], sizes = [8, 128], strides = [1, 1]} : vector<40x128xf32> to vector<8x128xf32>
    %2 = vector.extract_strided_slice %0 {offsets = [8, 0], sizes = [32, 128], strides = [1, 1]} : vector<40x128xf32> to vector<32x128xf32>
    %c0_1 = arith.constant 0 : index
    %c0_2 = arith.constant 0 : index
    %c0_3 = arith.constant 0 : index
    %3 = vector.load %arg1[%c0_1, %c0_2, %c0_3] : memref<2x8x8xf32, #tpu.memory_space<vmem>>, vector<1x8x8xf32>
    %4 = vector.shape_cast %3 : vector<1x8x8xf32> to vector<8x8xf32>
    %c1 = arith.constant 1 : index
    %c0_4 = arith.constant 0 : index
    %c0_5 = arith.constant 0 : index
    %5 = vector.load %arg1[%c1, %c0_4, %c0_5] : memref<2x8x8xf32, #tpu.memory_space<vmem>>, vector<1x8x8xf32>
    %6 = vector.shape_cast %5 : vector<1x8x8xf32> to vector<8x8xf32>
    %7 = tpu.concatenate %4, %6 in 0 : vector<8x8xf32>, vector<8x8xf32> -> vector<16x8xf32>
    %cst = arith.constant dense<0.000000e+00> : vector<16x128xf32>
    %8 = tpu.matmul %7, %1, %cst {dimension_numbers = #tpu.dot_dimension_numbers<[1], [0], [0], [1], [0, 0, 1, 1], [], []>} : vector<16x8xf32>, vector<8x128xf32>, vector<16x128xf32> -> vector<16x128xf32>
    %c0_6 = arith.constant 0 : index
    %c0_7 = arith.constant 0 : index
    %9 = vector.load %arg4[%c0_6, %c0_7] : memref<1x128xf32, #tpu.memory_space<vmem>>, vector<1x128xf32>
    %10 = vector.broadcast %9 : vector<1x128xf32> to vector<16x128xf32>
    %11 = arith.addf %8, %10 : vector<16x128xf32>
    %12 = vector.extract_strided_slice %11 {offsets = [0, 0], sizes = [8, 128], strides = [1, 1]} : vector<16x128xf32> to vector<8x128xf32>
    %13 = vector.extract_strided_slice %11 {offsets = [8, 0], sizes = [8, 128], strides = [1, 1]} : vector<16x128xf32> to vector<8x128xf32>
    %cst_8 = arith.constant 0.000000e+00 : f32
    %14 = vector.broadcast %cst_8 : f32 to vector<2x32xf32>
    %cst_9 = arith.constant 0.000000e+00 : f32
    %15 = vector.broadcast %cst_9 : f32 to vector<2x32xf32>
    %16 = vector.extract_strided_slice %12 {offsets = [0, 0], sizes = [1, 128], strides = [1, 1]} : vector<8x128xf32> to vector<1x128xf32>
    %17 = vector.extract_strided_slice %13 {offsets = [0, 0], sizes = [1, 128], strides = [1, 1]} : vector<8x128xf32> to vector<1x128xf32>
    %18 = tpu.concatenate %16, %17 in 0 : vector<1x128xf32>, vector<1x128xf32> -> vector<2x128xf32>
    %cst_10 = arith.constant dense<0.000000e+00> : vector<2x128xf32>
    %19 = tpu.matmul %14, %2, %cst_10 {dimension_numbers = #tpu.dot_dimension_numbers<[1], [0], [0], [1], [0, 0, 1, 1], [], []>} : vector<2x32xf32>, vector<32x128xf32>, vector<2x128xf32> -> vector<2x128xf32>
    %20 = arith.addf %18, %19 : vector<2x128xf32>
    %21 = vector.extract_strided_slice %20 {offsets = [0, 0], sizes = [2, 32], strides = [1, 1]} : vector<2x128xf32> to vector<2x32xf32>
    %22 = arith.negf %21 : vector<2x32xf32>
    %23 = math.exp %22 : vector<2x32xf32>
    %cst_11 = arith.constant 1.000000e+00 : f32
    %24 = vector.broadcast %cst_11 : f32 to vector<2x32xf32>
    %25 = arith.addf %24, %23 : vector<2x32xf32>
    %26 = arith.divf %24, %25 : vector<2x32xf32>
    %27 = vector.extract_strided_slice %20 {offsets = [0, 32], sizes = [2, 32], strides = [1, 1]} : vector<2x128xf32> to vector<2x32xf32>
    %28 = arith.negf %27 : vector<2x32xf32>
    %29 = math.exp %28 : vector<2x32xf32>
    %cst_12 = arith.constant 1.000000e+00 : f32
    %30 = vector.broadcast %cst_12 : f32 to vector<2x32xf32>
    %31 = arith.addf %30, %29 : vector<2x32xf32>
    %32 = arith.divf %30, %31 : vector<2x32xf32>
    %33 = vector.extract_strided_slice %20 {offsets = [0, 64], sizes = [2, 32], strides = [1, 1]} : vector<2x128xf32> to vector<2x32xf32>
    %34 = math.tanh %33 : vector<2x32xf32>
    %35 = vector.extract_strided_slice %20 {offsets = [0, 96], sizes = [2, 32], strides = [1, 1]} : vector<2x128xf32> to vector<2x32xf32>
    %36 = arith.negf %35 : vector<2x32xf32>
    %37 = math.exp %36 : vector<2x32xf32>
    %cst_13 = arith.constant 1.000000e+00 : f32
    %38 = vector.broadcast %cst_13 : f32 to vector<2x32xf32>
    %39 = arith.addf %38, %37 : vector<2x32xf32>
    %40 = arith.divf %38, %39 : vector<2x32xf32>
    %41 = arith.mulf %32, %15 : vector<2x32xf32>
    %42 = arith.mulf %26, %34 : vector<2x32xf32>
    %43 = arith.addf %41, %42 : vector<2x32xf32>
    %44 = math.tanh %43 : vector<2x32xf32>
    %45 = arith.mulf %40, %44 : vector<2x32xf32>
    %46 = vector.extract_strided_slice %12 {offsets = [1, 0], sizes = [1, 128], strides = [1, 1]} : vector<8x128xf32> to vector<1x128xf32>
    %47 = vector.extract_strided_slice %13 {offsets = [1, 0], sizes = [1, 128], strides = [1, 1]} : vector<8x128xf32> to vector<1x128xf32>
    %48 = tpu.concatenate %46, %47 in 0 : vector<1x128xf32>, vector<1x128xf32> -> vector<2x128xf32>
    %cst_14 = arith.constant dense<0.000000e+00> : vector<2x128xf32>
    %49 = tpu.matmul %45, %2, %cst_14 {dimension_numbers = #tpu.dot_dimension_numbers<[1], [0], [0], [1], [0, 0, 1, 1], [], []>} : vector<2x32xf32>, vector<32x128xf32>, vector<2x128xf32> -> vector<2x128xf32>
    %50 = arith.addf %48, %49 : vector<2x128xf32>
    %51 = vector.extract_strided_slice %50 {offsets = [0, 0], sizes = [2, 32], strides = [1, 1]} : vector<2x128xf32> to vector<2x32xf32>
    %52 = arith.negf %51 : vector<2x32xf32>
    %53 = math.exp %52 : vector<2x32xf32>
    %cst_15 = arith.constant 1.000000e+00 : f32
    %54 = vector.broadcast %cst_15 : f32 to vector<2x32xf32>
    %55 = arith.addf %54, %53 : vector<2x32xf32>
    %56 = arith.divf %54, %55 : vector<2x32xf32>
    %57 = vector.extract_strided_slice %50 {offsets = [0, 32], sizes = [2, 32], strides = [1, 1]} : vector<2x128xf32> to vector<2x32xf32>
    %58 = arith.negf %57 : vector<2x32xf32>
    %59 = math.exp %58 : vector<2x32xf32>
    %cst_16 = arith.constant 1.000000e+00 : f32
    %60 = vector.broadcast %cst_16 : f32 to vector<2x32xf32>
    %61 = arith.addf %60, %59 : vector<2x32xf32>
    %62 = arith.divf %60, %61 : vector<2x32xf32>
    %63 = vector.extract_strided_slice %50 {offsets = [0, 64], sizes = [2, 32], strides = [1, 1]} : vector<2x128xf32> to vector<2x32xf32>
    %64 = math.tanh %63 : vector<2x32xf32>
    %65 = vector.extract_strided_slice %50 {offsets = [0, 96], sizes = [2, 32], strides = [1, 1]} : vector<2x128xf32> to vector<2x32xf32>
    %66 = arith.negf %65 : vector<2x32xf32>
    %67 = math.exp %66 : vector<2x32xf32>
    %cst_17 = arith.constant 1.000000e+00 : f32
    %68 = vector.broadcast %cst_17 : f32 to vector<2x32xf32>
    %69 = arith.addf %68, %67 : vector<2x32xf32>
    %70 = arith.divf %68, %69 : vector<2x32xf32>
    %71 = arith.mulf %62, %43 : vector<2x32xf32>
    %72 = arith.mulf %56, %64 : vector<2x32xf32>
    %73 = arith.addf %71, %72 : vector<2x32xf32>
    %74 = math.tanh %73 : vector<2x32xf32>
    %75 = arith.mulf %70, %74 : vector<2x32xf32>
    %76 = vector.extract_strided_slice %12 {offsets = [2, 0], sizes = [1, 128], strides = [1, 1]} : vector<8x128xf32> to vector<1x128xf32>
    %77 = vector.extract_strided_slice %13 {offsets = [2, 0], sizes = [1, 128], strides = [1, 1]} : vector<8x128xf32> to vector<1x128xf32>
    %78 = tpu.concatenate %76, %77 in 0 : vector<1x128xf32>, vector<1x128xf32> -> vector<2x128xf32>
    %cst_18 = arith.constant dense<0.000000e+00> : vector<2x128xf32>
    %79 = tpu.matmul %75, %2, %cst_18 {dimension_numbers = #tpu.dot_dimension_numbers<[1], [0], [0], [1], [0, 0, 1, 1], [], []>} : vector<2x32xf32>, vector<32x128xf32>, vector<2x128xf32> -> vector<2x128xf32>
    %80 = arith.addf %78, %79 : vector<2x128xf32>
    %81 = vector.extract_strided_slice %80 {offsets = [0, 0], sizes = [2, 32], strides = [1, 1]} : vector<2x128xf32> to vector<2x32xf32>
    %82 = arith.negf %81 : vector<2x32xf32>
    %83 = math.exp %82 : vector<2x32xf32>
    %cst_19 = arith.constant 1.000000e+00 : f32
    %84 = vector.broadcast %cst_19 : f32 to vector<2x32xf32>
    %85 = arith.addf %84, %83 : vector<2x32xf32>
    %86 = arith.divf %84, %85 : vector<2x32xf32>
    %87 = vector.extract_strided_slice %80 {offsets = [0, 32], sizes = [2, 32], strides = [1, 1]} : vector<2x128xf32> to vector<2x32xf32>
    %88 = arith.negf %87 : vector<2x32xf32>
    %89 = math.exp %88 : vector<2x32xf32>
    %cst_20 = arith.constant 1.000000e+00 : f32
    %90 = vector.broadcast %cst_20 : f32 to vector<2x32xf32>
    %91 = arith.addf %90, %89 : vector<2x32xf32>
    %92 = arith.divf %90, %91 : vector<2x32xf32>
    %93 = vector.extract_strided_slice %80 {offsets = [0, 64], sizes = [2, 32], strides = [1, 1]} : vector<2x128xf32> to vector<2x32xf32>
    %94 = math.tanh %93 : vector<2x32xf32>
    %95 = vector.extract_strided_slice %80 {offsets = [0, 96], sizes = [2, 32], strides = [1, 1]} : vector<2x128xf32> to vector<2x32xf32>
    %96 = arith.negf %95 : vector<2x32xf32>
    %97 = math.exp %96 : vector<2x32xf32>
    %cst_21 = arith.constant 1.000000e+00 : f32
    %98 = vector.broadcast %cst_21 : f32 to vector<2x32xf32>
    %99 = arith.addf %98, %97 : vector<2x32xf32>
    %100 = arith.divf %98, %99 : vector<2x32xf32>
    %101 = arith.mulf %92, %73 : vector<2x32xf32>
    %102 = arith.mulf %86, %94 : vector<2x32xf32>
    %103 = arith.addf %101, %102 : vector<2x32xf32>
    %104 = math.tanh %103 : vector<2x32xf32>
    %105 = arith.mulf %100, %104 : vector<2x32xf32>
    %106 = vector.extract_strided_slice %12 {offsets = [3, 0], sizes = [1, 128], strides = [1, 1]} : vector<8x128xf32> to vector<1x128xf32>
    %107 = vector.extract_strided_slice %13 {offsets = [3, 0], sizes = [1, 128], strides = [1, 1]} : vector<8x128xf32> to vector<1x128xf32>
    %108 = tpu.concatenate %106, %107 in 0 : vector<1x128xf32>, vector<1x128xf32> -> vector<2x128xf32>
    %cst_22 = arith.constant dense<0.000000e+00> : vector<2x128xf32>
    %109 = tpu.matmul %105, %2, %cst_22 {dimension_numbers = #tpu.dot_dimension_numbers<[1], [0], [0], [1], [0, 0, 1, 1], [], []>} : vector<2x32xf32>, vector<32x128xf32>, vector<2x128xf32> -> vector<2x128xf32>
    %110 = arith.addf %108, %109 : vector<2x128xf32>
    %111 = vector.extract_strided_slice %110 {offsets = [0, 0], sizes = [2, 32], strides = [1, 1]} : vector<2x128xf32> to vector<2x32xf32>
    %112 = arith.negf %111 : vector<2x32xf32>
    %113 = math.exp %112 : vector<2x32xf32>
    %cst_23 = arith.constant 1.000000e+00 : f32
    %114 = vector.broadcast %cst_23 : f32 to vector<2x32xf32>
    %115 = arith.addf %114, %113 : vector<2x32xf32>
    %116 = arith.divf %114, %115 : vector<2x32xf32>
    %117 = vector.extract_strided_slice %110 {offsets = [0, 32], sizes = [2, 32], strides = [1, 1]} : vector<2x128xf32> to vector<2x32xf32>
    %118 = arith.negf %117 : vector<2x32xf32>
    %119 = math.exp %118 : vector<2x32xf32>
    %cst_24 = arith.constant 1.000000e+00 : f32
    %120 = vector.broadcast %cst_24 : f32 to vector<2x32xf32>
    %121 = arith.addf %120, %119 : vector<2x32xf32>
    %122 = arith.divf %120, %121 : vector<2x32xf32>
    %123 = vector.extract_strided_slice %110 {offsets = [0, 64], sizes = [2, 32], strides = [1, 1]} : vector<2x128xf32> to vector<2x32xf32>
    %124 = math.tanh %123 : vector<2x32xf32>
    %125 = vector.extract_strided_slice %110 {offsets = [0, 96], sizes = [2, 32], strides = [1, 1]} : vector<2x128xf32> to vector<2x32xf32>
    %126 = arith.negf %125 : vector<2x32xf32>
    %127 = math.exp %126 : vector<2x32xf32>
    %cst_25 = arith.constant 1.000000e+00 : f32
    %128 = vector.broadcast %cst_25 : f32 to vector<2x32xf32>
    %129 = arith.addf %128, %127 : vector<2x32xf32>
    %130 = arith.divf %128, %129 : vector<2x32xf32>
    %131 = arith.mulf %122, %103 : vector<2x32xf32>
    %132 = arith.mulf %116, %124 : vector<2x32xf32>
    %133 = arith.addf %131, %132 : vector<2x32xf32>
    %134 = math.tanh %133 : vector<2x32xf32>
    %135 = arith.mulf %130, %134 : vector<2x32xf32>
    %136 = vector.extract_strided_slice %12 {offsets = [4, 0], sizes = [1, 128], strides = [1, 1]} : vector<8x128xf32> to vector<1x128xf32>
    %137 = vector.extract_strided_slice %13 {offsets = [4, 0], sizes = [1, 128], strides = [1, 1]} : vector<8x128xf32> to vector<1x128xf32>
    %138 = tpu.concatenate %136, %137 in 0 : vector<1x128xf32>, vector<1x128xf32> -> vector<2x128xf32>
    %cst_26 = arith.constant dense<0.000000e+00> : vector<2x128xf32>
    %139 = tpu.matmul %135, %2, %cst_26 {dimension_numbers = #tpu.dot_dimension_numbers<[1], [0], [0], [1], [0, 0, 1, 1], [], []>} : vector<2x32xf32>, vector<32x128xf32>, vector<2x128xf32> -> vector<2x128xf32>
    %140 = arith.addf %138, %139 : vector<2x128xf32>
    %141 = vector.extract_strided_slice %140 {offsets = [0, 0], sizes = [2, 32], strides = [1, 1]} : vector<2x128xf32> to vector<2x32xf32>
    %142 = arith.negf %141 : vector<2x32xf32>
    %143 = math.exp %142 : vector<2x32xf32>
    %cst_27 = arith.constant 1.000000e+00 : f32
    %144 = vector.broadcast %cst_27 : f32 to vector<2x32xf32>
    %145 = arith.addf %144, %143 : vector<2x32xf32>
    %146 = arith.divf %144, %145 : vector<2x32xf32>
    %147 = vector.extract_strided_slice %140 {offsets = [0, 32], sizes = [2, 32], strides = [1, 1]} : vector<2x128xf32> to vector<2x32xf32>
    %148 = arith.negf %147 : vector<2x32xf32>
    %149 = math.exp %148 : vector<2x32xf32>
    %cst_28 = arith.constant 1.000000e+00 : f32
    %150 = vector.broadcast %cst_28 : f32 to vector<2x32xf32>
    %151 = arith.addf %150, %149 : vector<2x32xf32>
    %152 = arith.divf %150, %151 : vector<2x32xf32>
    %153 = vector.extract_strided_slice %140 {offsets = [0, 64], sizes = [2, 32], strides = [1, 1]} : vector<2x128xf32> to vector<2x32xf32>
    %154 = math.tanh %153 : vector<2x32xf32>
    %155 = vector.extract_strided_slice %140 {offsets = [0, 96], sizes = [2, 32], strides = [1, 1]} : vector<2x128xf32> to vector<2x32xf32>
    %156 = arith.negf %155 : vector<2x32xf32>
    %157 = math.exp %156 : vector<2x32xf32>
    %cst_29 = arith.constant 1.000000e+00 : f32
    %158 = vector.broadcast %cst_29 : f32 to vector<2x32xf32>
    %159 = arith.addf %158, %157 : vector<2x32xf32>
    %160 = arith.divf %158, %159 : vector<2x32xf32>
    %161 = arith.mulf %152, %133 : vector<2x32xf32>
    %162 = arith.mulf %146, %154 : vector<2x32xf32>
    %163 = arith.addf %161, %162 : vector<2x32xf32>
    %164 = math.tanh %163 : vector<2x32xf32>
    %165 = arith.mulf %160, %164 : vector<2x32xf32>
    %166 = vector.extract_strided_slice %12 {offsets = [5, 0], sizes = [1, 128], strides = [1, 1]} : vector<8x128xf32> to vector<1x128xf32>
    %167 = vector.extract_strided_slice %13 {offsets = [5, 0], sizes = [1, 128], strides = [1, 1]} : vector<8x128xf32> to vector<1x128xf32>
    %168 = tpu.concatenate %166, %167 in 0 : vector<1x128xf32>, vector<1x128xf32> -> vector<2x128xf32>
    %cst_30 = arith.constant dense<0.000000e+00> : vector<2x128xf32>
    %169 = tpu.matmul %165, %2, %cst_30 {dimension_numbers = #tpu.dot_dimension_numbers<[1], [0], [0], [1], [0, 0, 1, 1], [], []>} : vector<2x32xf32>, vector<32x128xf32>, vector<2x128xf32> -> vector<2x128xf32>
    %170 = arith.addf %168, %169 : vector<2x128xf32>
    %171 = vector.extract_strided_slice %170 {offsets = [0, 0], sizes = [2, 32], strides = [1, 1]} : vector<2x128xf32> to vector<2x32xf32>
    %172 = arith.negf %171 : vector<2x32xf32>
    %173 = math.exp %172 : vector<2x32xf32>
    %cst_31 = arith.constant 1.000000e+00 : f32
    %174 = vector.broadcast %cst_31 : f32 to vector<2x32xf32>
    %175 = arith.addf %174, %173 : vector<2x32xf32>
    %176 = arith.divf %174, %175 : vector<2x32xf32>
    %177 = vector.extract_strided_slice %170 {offsets = [0, 32], sizes = [2, 32], strides = [1, 1]} : vector<2x128xf32> to vector<2x32xf32>
    %178 = arith.negf %177 : vector<2x32xf32>
    %179 = math.exp %178 : vector<2x32xf32>
    %cst_32 = arith.constant 1.000000e+00 : f32
    %180 = vector.broadcast %cst_32 : f32 to vector<2x32xf32>
    %181 = arith.addf %180, %179 : vector<2x32xf32>
    %182 = arith.divf %180, %181 : vector<2x32xf32>
    %183 = vector.extract_strided_slice %170 {offsets = [0, 64], sizes = [2, 32], strides = [1, 1]} : vector<2x128xf32> to vector<2x32xf32>
    %184 = math.tanh %183 : vector<2x32xf32>
    %185 = vector.extract_strided_slice %170 {offsets = [0, 96], sizes = [2, 32], strides = [1, 1]} : vector<2x128xf32> to vector<2x32xf32>
    %186 = arith.negf %185 : vector<2x32xf32>
    %187 = math.exp %186 : vector<2x32xf32>
    %cst_33 = arith.constant 1.000000e+00 : f32
    %188 = vector.broadcast %cst_33 : f32 to vector<2x32xf32>
    %189 = arith.addf %188, %187 : vector<2x32xf32>
    %190 = arith.divf %188, %189 : vector<2x32xf32>
    %191 = arith.mulf %182, %163 : vector<2x32xf32>
    %192 = arith.mulf %176, %184 : vector<2x32xf32>
    %193 = arith.addf %191, %192 : vector<2x32xf32>
    %194 = math.tanh %193 : vector<2x32xf32>
    %195 = arith.mulf %190, %194 : vector<2x32xf32>
    %196 = vector.extract_strided_slice %12 {offsets = [6, 0], sizes = [1, 128], strides = [1, 1]} : vector<8x128xf32> to vector<1x128xf32>
    %197 = vector.extract_strided_slice %13 {offsets = [6, 0], sizes = [1, 128], strides = [1, 1]} : vector<8x128xf32> to vector<1x128xf32>
    %198 = tpu.concatenate %196, %197 in 0 : vector<1x128xf32>, vector<1x128xf32> -> vector<2x128xf32>
    %cst_34 = arith.constant dense<0.000000e+00> : vector<2x128xf32>
    %199 = tpu.matmul %195, %2, %cst_34 {dimension_numbers = #tpu.dot_dimension_numbers<[1], [0], [0], [1], [0, 0, 1, 1], [], []>} : vector<2x32xf32>, vector<32x128xf32>, vector<2x128xf32> -> vector<2x128xf32>
    %200 = arith.addf %198, %199 : vector<2x128xf32>
    %201 = vector.extract_strided_slice %200 {offsets = [0, 0], sizes = [2, 32], strides = [1, 1]} : vector<2x128xf32> to vector<2x32xf32>
    %202 = arith.negf %201 : vector<2x32xf32>
    %203 = math.exp %202 : vector<2x32xf32>
    %cst_35 = arith.constant 1.000000e+00 : f32
    %204 = vector.broadcast %cst_35 : f32 to vector<2x32xf32>
    %205 = arith.addf %204, %203 : vector<2x32xf32>
    %206 = arith.divf %204, %205 : vector<2x32xf32>
    %207 = vector.extract_strided_slice %200 {offsets = [0, 32], sizes = [2, 32], strides = [1, 1]} : vector<2x128xf32> to vector<2x32xf32>
    %208 = arith.negf %207 : vector<2x32xf32>
    %209 = math.exp %208 : vector<2x32xf32>
    %cst_36 = arith.constant 1.000000e+00 : f32
    %210 = vector.broadcast %cst_36 : f32 to vector<2x32xf32>
    %211 = arith.addf %210, %209 : vector<2x32xf32>
    %212 = arith.divf %210, %211 : vector<2x32xf32>
    %213 = vector.extract_strided_slice %200 {offsets = [0, 64], sizes = [2, 32], strides = [1, 1]} : vector<2x128xf32> to vector<2x32xf32>
    %214 = math.tanh %213 : vector<2x32xf32>
    %215 = vector.extract_strided_slice %200 {offsets = [0, 96], sizes = [2, 32], strides = [1, 1]} : vector<2x128xf32> to vector<2x32xf32>
    %216 = arith.negf %215 : vector<2x32xf32>
    %217 = math.exp %216 : vector<2x32xf32>
    %cst_37 = arith.constant 1.000000e+00 : f32
    %218 = vector.broadcast %cst_37 : f32 to vector<2x32xf32>
    %219 = arith.addf %218, %217 : vector<2x32xf32>
    %220 = arith.divf %218, %219 : vector<2x32xf32>
    %221 = arith.mulf %212, %193 : vector<2x32xf32>
    %222 = arith.mulf %206, %214 : vector<2x32xf32>
    %223 = arith.addf %221, %222 : vector<2x32xf32>
    %224 = math.tanh %223 : vector<2x32xf32>
    %225 = arith.mulf %220, %224 : vector<2x32xf32>
    %226 = vector.extract_strided_slice %12 {offsets = [7, 0], sizes = [1, 128], strides = [1, 1]} : vector<8x128xf32> to vector<1x128xf32>
    %227 = vector.extract_strided_slice %13 {offsets = [7, 0], sizes = [1, 128], strides = [1, 1]} : vector<8x128xf32> to vector<1x128xf32>
    %228 = tpu.concatenate %226, %227 in 0 : vector<1x128xf32>, vector<1x128xf32> -> vector<2x128xf32>
    %cst_38 = arith.constant dense<0.000000e+00> : vector<2x128xf32>
    %229 = tpu.matmul %225, %2, %cst_38 {dimension_numbers = #tpu.dot_dimension_numbers<[1], [0], [0], [1], [0, 0, 1, 1], [], []>} : vector<2x32xf32>, vector<32x128xf32>, vector<2x128xf32> -> vector<2x128xf32>
    %230 = arith.addf %228, %229 : vector<2x128xf32>
    %231 = vector.extract_strided_slice %230 {offsets = [0, 0], sizes = [2, 32], strides = [1, 1]} : vector<2x128xf32> to vector<2x32xf32>
    %232 = arith.negf %231 : vector<2x32xf32>
    %233 = math.exp %232 : vector<2x32xf32>
    %cst_39 = arith.constant 1.000000e+00 : f32
    %234 = vector.broadcast %cst_39 : f32 to vector<2x32xf32>
    %235 = arith.addf %234, %233 : vector<2x32xf32>
    %236 = arith.divf %234, %235 : vector<2x32xf32>
    %237 = vector.extract_strided_slice %230 {offsets = [0, 32], sizes = [2, 32], strides = [1, 1]} : vector<2x128xf32> to vector<2x32xf32>
    %238 = arith.negf %237 : vector<2x32xf32>
    %239 = math.exp %238 : vector<2x32xf32>
    %cst_40 = arith.constant 1.000000e+00 : f32
    %240 = vector.broadcast %cst_40 : f32 to vector<2x32xf32>
    %241 = arith.addf %240, %239 : vector<2x32xf32>
    %242 = arith.divf %240, %241 : vector<2x32xf32>
    %243 = vector.extract_strided_slice %230 {offsets = [0, 64], sizes = [2, 32], strides = [1, 1]} : vector<2x128xf32> to vector<2x32xf32>
    %244 = math.tanh %243 : vector<2x32xf32>
    %245 = vector.extract_strided_slice %230 {offsets = [0, 96], sizes = [2, 32], strides = [1, 1]} : vector<2x128xf32> to vector<2x32xf32>
    %246 = arith.negf %245 : vector<2x32xf32>
    %247 = math.exp %246 : vector<2x32xf32>
    %cst_41 = arith.constant 1.000000e+00 : f32
    %248 = vector.broadcast %cst_41 : f32 to vector<2x32xf32>
    %249 = arith.addf %248, %247 : vector<2x32xf32>
    %250 = arith.divf %248, %249 : vector<2x32xf32>
    %251 = arith.mulf %242, %223 : vector<2x32xf32>
    %252 = arith.mulf %236, %244 : vector<2x32xf32>
    %253 = arith.addf %251, %252 : vector<2x32xf32>
    %254 = math.tanh %253 : vector<2x32xf32>
    %255 = arith.mulf %250, %254 : vector<2x32xf32>
    %c0_42 = arith.constant 0 : index
    %c0_43 = arith.constant 0 : index
    %c0_44 = arith.constant 0 : index
    %256 = vector.load %arg2[%c0_42, %c0_43, %c0_44] : memref<2x8x4xf32, #tpu.memory_space<vmem>>, vector<2x8x4xf32>
    %257 = vector.extract_strided_slice %256 {offsets = [0, 7, 0], sizes = [2, 1, 4], strides = [1, 1, 1]} : vector<2x8x4xf32> to vector<2x1x4xf32>
    %258 = vector.shape_cast %257 : vector<2x1x4xf32> to vector<2x4xf32>
    %c0_45 = arith.constant 0 : index
    %c0_46 = arith.constant 0 : index
    %259 = vector.load %arg5[%c0_45, %c0_46] : memref<36x256xf32, #tpu.memory_space<vmem>>, vector<36x256xf32>
    %260 = vector.extract_strided_slice %259 {offsets = [0, 0], sizes = [32, 256], strides = [1, 1]} : vector<36x256xf32> to vector<32x256xf32>
    %cst_47 = arith.constant dense<0.000000e+00> : vector<2x256xf32>
    %261 = tpu.matmul %255, %260, %cst_47 {dimension_numbers = #tpu.dot_dimension_numbers<[1], [0], [0], [1], [0, 0, 1, 1], [], []>} : vector<2x32xf32>, vector<32x256xf32>, vector<2x256xf32> -> vector<2x256xf32>
    %262 = vector.extract_strided_slice %259 {offsets = [32, 0], sizes = [4, 256], strides = [1, 1]} : vector<36x256xf32> to vector<4x256xf32>
    %cst_48 = arith.constant dense<0.000000e+00> : vector<2x256xf32>
    %263 = tpu.matmul %258, %262, %cst_48 {dimension_numbers = #tpu.dot_dimension_numbers<[1], [0], [0], [1], [0, 0, 1, 1], [], []>} : vector<2x4xf32>, vector<4x256xf32>, vector<2x256xf32> -> vector<2x256xf32>
    %264 = arith.addf %261, %263 : vector<2x256xf32>
    %c0_49 = arith.constant 0 : index
    %c0_50 = arith.constant 0 : index
    %265 = vector.load %arg6[%c0_49, %c0_50] : memref<1x256xf32, #tpu.memory_space<vmem>>, vector<1x256xf32>
    %266 = vector.broadcast %265 : vector<1x256xf32> to vector<2x256xf32>
    %267 = arith.addf %264, %266 : vector<2x256xf32>
    %cst_51 = arith.constant 0.000000e+00 : f32
    %268 = vector.broadcast %cst_51 : f32 to vector<2x256xf32>
    %269 = arith.maximumf %267, %268 : vector<2x256xf32>
    %c0_52 = arith.constant 0 : index
    %c0_53 = arith.constant 0 : index
    %270 = vector.load %arg7[%c0_52, %c0_53] : memref<256x128xf32, #tpu.memory_space<vmem>>, vector<256x128xf32>
    %cst_54 = arith.constant dense<0.000000e+00> : vector<2x128xf32>
    %271 = tpu.matmul %269, %270, %cst_54 {dimension_numbers = #tpu.dot_dimension_numbers<[1], [0], [0], [1], [0, 0, 1, 1], [], []>} : vector<2x256xf32>, vector<256x128xf32>, vector<2x128xf32> -> vector<2x128xf32>
    %c0_55 = arith.constant 0 : index
    %c0_56 = arith.constant 0 : index
    %272 = vector.load %arg8[%c0_55, %c0_56] : memref<1x128xf32, #tpu.memory_space<vmem>>, vector<1x128xf32>
    %273 = vector.broadcast %272 : vector<1x128xf32> to vector<2x128xf32>
    %274 = arith.addf %271, %273 : vector<2x128xf32>
    %cst_57 = arith.constant 0.000000e+00 : f32
    %275 = vector.broadcast %cst_57 : f32 to vector<2x128xf32>
    %276 = arith.maximumf %274, %275 : vector<2x128xf32>
    %c0_58 = arith.constant 0 : index
    %c0_59 = arith.constant 0 : index
    %277 = vector.load %arg9[%c0_58, %c0_59] : memref<128x8xf32, #tpu.memory_space<vmem>>, vector<128x8xf32>
    %cst_60 = arith.constant dense<0.000000e+00> : vector<2x8xf32>
    %278 = tpu.matmul %276, %277, %cst_60 {dimension_numbers = #tpu.dot_dimension_numbers<[1], [0], [0], [1], [0, 0, 1, 1], [], []>} : vector<2x128xf32>, vector<128x8xf32>, vector<2x8xf32> -> vector<2x8xf32>
    %c0_61 = arith.constant 0 : index
    %c0_62 = arith.constant 0 : index
    %279 = vector.load %arg10[%c0_61, %c0_62] : memref<1x8xf32, #tpu.memory_space<vmem>>, vector<1x8xf32>
    %280 = vector.broadcast %279 : vector<1x8xf32> to vector<2x8xf32>
    %281 = arith.addf %278, %280 : vector<2x8xf32>
    %282 = tpu.iota {dimensions = array<i32: 0>} : vector<8x8xi32>
    %c0_63 = arith.constant 0 : index
    %283 = memref.load %arg0[%c0_63] : memref<2xi32, #tpu.memory_space<smem>>
    %c1_i32 = arith.constant 1 : i32
    %284 = arith.addi %283, %c1_i32 : i32
    %285 = vector.broadcast %284 : i32 to vector<8x8xi32>
    %286 = arith.cmpi eq, %282, %285 : vector<8x8xi32>
    %c8_i32 = arith.constant 8 : i32
    %287 = arith.cmpi slt, %284, %c8_i32 : i32
    %288 = vector.broadcast %287 : i1 to vector<8x8xi1>
    %289 = arith.andi %286, %288 : vector<8x8xi1>
    %290 = vector.extract_strided_slice %281 {offsets = [0, 0], sizes = [1, 8], strides = [1, 1]} : vector<2x8xf32> to vector<1x8xf32>
    %c0_64 = arith.constant 0 : index
    %c0_65 = arith.constant 0 : index
    %c0_66 = arith.constant 0 : index
    %291 = vector.load %arg1[%c0_64, %c0_65, %c0_66] : memref<2x8x8xf32, #tpu.memory_space<vmem>>, vector<1x8x8xf32>
    %292 = vector.shape_cast %291 : vector<1x8x8xf32> to vector<8x8xf32>
    %293 = vector.shape_cast %290 : vector<1x8xf32> to vector<1x8xf32>
    %294 = vector.broadcast %293 : vector<1x8xf32> to vector<8x8xf32>
    %295 = arith.select %289, %294, %292 : vector<8x8xi1>, vector<8x8xf32>
    %c0_67 = arith.constant 0 : index
    %c0_68 = arith.constant 0 : index
    %c0_69 = arith.constant 0 : index
    %296 = vector.load %arg11[%c0_67, %c0_68, %c0_69] : memref<2x8x8xf32, #tpu.memory_space<vmem>>, vector<1x8x8xf32>
    %297 = vector.shape_cast %296 : vector<1x8x8xf32> to vector<8x8xf32>
    %298 = vector.shape_cast %295 : vector<8x8xf32> to vector<1x8x8xf32>
    tpu.vector_store %arg11[%c0_67, %c0_68, %c0_69], %298 {strides = array<i32>} : memref<2x8x8xf32, #tpu.memory_space<vmem>>, vector<1x8x8xf32>,
    %c1_70 = arith.constant 1 : index
    %299 = memref.load %arg0[%c1_70] : memref<2xi32, #tpu.memory_space<smem>>
    %c1_i32_71 = arith.constant 1 : i32
    %300 = arith.addi %299, %c1_i32_71 : i32
    %301 = vector.broadcast %300 : i32 to vector<8x8xi32>
    %302 = arith.cmpi eq, %282, %301 : vector<8x8xi32>
    %c8_i32_72 = arith.constant 8 : i32
    %303 = arith.cmpi slt, %300, %c8_i32_72 : i32
    %304 = vector.broadcast %303 : i1 to vector<8x8xi1>
    %305 = arith.andi %302, %304 : vector<8x8xi1>
    %306 = vector.extract_strided_slice %281 {offsets = [1, 0], sizes = [1, 8], strides = [1, 1]} : vector<2x8xf32> to vector<1x8xf32>
    %c1_73 = arith.constant 1 : index
    %c0_74 = arith.constant 0 : index
    %c0_75 = arith.constant 0 : index
    %307 = vector.load %arg1[%c1_73, %c0_74, %c0_75] : memref<2x8x8xf32, #tpu.memory_space<vmem>>, vector<1x8x8xf32>
    %308 = vector.shape_cast %307 : vector<1x8x8xf32> to vector<8x8xf32>
    %309 = vector.shape_cast %306 : vector<1x8xf32> to vector<1x8xf32>
    %310 = vector.broadcast %309 : vector<1x8xf32> to vector<8x8xf32>
    %311 = arith.select %305, %310, %308 : vector<8x8xi1>, vector<8x8xf32>
    %c1_76 = arith.constant 1 : index
    %c0_77 = arith.constant 0 : index
    %c0_78 = arith.constant 0 : index
    %312 = vector.load %arg11[%c1_76, %c0_77, %c0_78] : memref<2x8x8xf32, #tpu.memory_space<vmem>>, vector<1x8x8xf32>
    %313 = vector.shape_cast %312 : vector<1x8x8xf32> to vector<8x8xf32>
    %314 = vector.shape_cast %311 : vector<8x8xf32> to vector<1x8x8xf32>
    tpu.vector_store %arg11[%c1_76, %c0_77, %c0_78], %314 {strides = array<i32>} : memref<2x8x8xf32, #tpu.memory_space<vmem>>, vector<1x8x8xf32>,
    return
  }
}

</mosaic_0001>

<bundles_post_ra>
// kernel: tpu_custom_call.1
= control target key start
LH: loop header
LB: loop body
LE: loop exit
PB: predicated region body
PF: predicated region fallthrough
CT: control target
= control target key end

     0   :  { %16 = vsyncpa [#allocation5], 0  ;;  %s2258_s0 = inlined_call_operand.vmem [shape: s32[2], index: 0, kind: input, shape index: {}]   ;;  %s2259_s1 = inlined_call_operand.hbm [shape: f32[2,8,8], index: 1, kind: input, shape index: {}, may-alias: {1,11}]   ;;  %s2260_s2 = inlined_call_operand.vmem [shape: f32[2,8,4], index: 2, kind: input, shape index: {}]   ;;  %s2261_s3 = inlined_call_operand.vmem [shape: f32[40,128], index: 3, kind: input, shape index: {}]   ;;  %s2262_s4 = inlined_call_operand.vmem [shape: f32[1,128], index: 4, kind: input, shape index: {}]   ;;  %s2263_s5 = inlined_call_operand.vmem [shape: f32[36,256], index: 5, kind: input, shape index: {}]   ;;  %s2264_s6 = inlined_call_operand.vmem [shape: f32[1,256], index: 6, kind: input, shape index: {}]   ;;  %s2265_s7 = inlined_call_operand.hbm [shape: f32[256,128], index: 7, kind: input, shape index: {}]   ;;  %s2266_s8 = inlined_call_operand.vmem [shape: f32[1,128], index: 8, kind: input, shape index: {}]   ;;  %s2267_s9 = inlined_call_operand.vmem [shape: f32[128,8], index: 9, kind: input, shape index: {}]   ;;  %s2268_s10 = inlined_call_operand.vmem [shape: f32[1,8], index: 10, kind: input, shape index: {}]   ;;  %s2269_s11 = inlined_call_operand.hbm [shape: f32[2,8,8], index: 11, kind: output, shape index: {}, may-alias: {1,11}]  }
   0x1   :  { %17 = vsyncpa [#allocation3], 0 }
   0x2   :  { %18 = vsyncpa [#allocation8], 0 }
   0x3   :  { %19 = vsyncpa [#allocation4], 0  ;;  %s26_s19 = sshll.u32 %s2258_s0, 4  ;;  %s27_s19 = int_to_ptr.vmem [resolvable:$true] %s26_s19 }
   0x4   :  { %s1786_s20 = scalar_lea.vmem %s27_s19, 16  ;;  %p1791_p1 = scmp.lt.s32.totalorder %s27_s19, %s27_s19 }
   0x5   :  { %p1787_p0 = scmp.ne.s32.totalorder %s27_s19, %s1786_s20  ;;  %p1792_p2 = scmp.lt.s32.totalorder %s1786_s20, %s1786_s20 }
   0x7   :  { %p1793_p3 = por %p1792_p2, %p1791_p1 }
   0x9   :  { %p1794_p4 = pnand %p1793_p3, %p1787_p0 }
   0xb   :  { %1797 = shalt.err (!%p1794_p4)
}
   0xc   :  { %s1866_s21 = smov [#allocation2]   ;;  %s1867_s22 = smov [#allocation6]  }
   0xd   :  { %29 = dma.vmem_to_smem %s27_s19, 16, %s1866_s21, [#allocation5]  }
   0xe   :  { %s35_s23 = sshll.u32 %s1867_s22, 4  ;;  %s36_s23 = int_to_ptr.vmem [resolvable:$true] %s35_s23 }
   0xf   :  { %s1806_s24 = scalar_lea.vmem %s36_s23, 256  ;;  %p1811_p6 = scmp.lt.s32.totalorder %s36_s23, %s36_s23 }
  0x10   :  { %p1807_p5 = scmp.ne.s32.totalorder %s36_s23, %s1806_s24  ;;  %p1812_p7 = scmp.lt.s32.totalorder %s1806_s24, %s1806_s24 }
  0x12   :  { %p1813_p8 = por %p1812_p7, %p1811_p6 }
  0x14   :  { %p1814_p9 = pnand %p1813_p8, %p1807_p5 }
  0x16   :  { %1817 = shalt.err (!%p1814_p9)
}
  0x17   :  { %s1868_s0 = smov 128   ;;  %s1869_s25 = smov 8  }
  0x18   :  { %41 = dma.hbm_to_vmem [thread:$0]  %s2259_s1, 256, %s36_s23, [#allocation3], %s1868_s0, %s1868_s0, %s1869_s25  }
  0x19   :  { %s1870_s28 = smov [#allocation7]  }
  0x1a   :  { %s57_s29 = sshll.u32 %s1870_s28, 4  ;;  %s58_s29 = int_to_ptr.vmem [resolvable:$true] %s57_s29 }
  0x1b   :  { %s1826_s30 = scalar_lea.vmem %s58_s29, 4096  ;;  %p1831_p11 = scmp.lt.s32.totalorder %s58_s29, %s58_s29 }
  0x1c   :  { %p1827_p10 = scmp.ne.s32.totalorder %s58_s29, %s1826_s30  ;;  %p1832_p12 = scmp.lt.s32.totalorder %s1826_s30, %s1826_s30 }
  0x1e   :  { %p1833_p13 = por %p1832_p12, %p1831_p11 }
  0x20   :  { %p1834_p0 = pnand %p1833_p13, %p1827_p10 }
  0x22   :  { %1837 = shalt.err (!%p1834_p0)
}
  0x23   :  { %63 = dma.hbm_to_vmem [thread:$0]  %s2265_s7, 4096, %s58_s29, [#allocation8], %s1868_s0, %s1868_s0, %s1869_s25  }
  0x24   :  { %1858 = dma.done.wait [#allocation5], 16  }
  0x25   :  { %1859 = vsyncadd [#allocation5], 4294967280 }
  0x26   :  { %1860 = dma.done.wait [#allocation3], 256  }
  0x27   :  { %1861 = vsyncadd [#allocation3], 4294967040 }
  0x28   :  { %1862 = dma.done.wait [#allocation8], 4096  }
  0x29   :  { %1863 = vsyncadd [#allocation8], 4294963200 }
  0x2a   :  { %79 = sfence }
  0x2b   :  { %v80_v0 = vld [vmem:[%s2261_s3] sm:$0xff]  ;;  %vm95_vm0 = vcmask 64512   ;;  %v87_v2 = vld [vmem:[#allocation6 + $0x8] sm:$0xff]  ;;  %v1871_v4 = vmov 0.0   ;;  %v1966_v5 = vld [vmem:[%s2261_s3 + $0x18] sm:$0xff]  ;;  %vm1872_vm1 = vmmov 0  }
  0x2c   :  { %v85_v1 = vld [vmem:[#allocation6] sm:$0xff]  ;;  %1582 = vmatprep.subr.mxu1 %v80_v0  ;;  %1598 = vmatprep.subr.mxu0 %v1871_v4  ;;  %v1975_v6 = vld [vmem:[%s2261_s3 + $0x10] sm:$0xff]  ;;  %v1984_v7 = vld [vmem:[%s2261_s3 + $0x8] sm:$0xff]  ;;  %vm180_vm2 = vcmask 1040384   ;;  %s1874_s23 = smov 32   ;;  %vm182_vm3 = vcmask 261120  }
  0x2d   :  { %1584 = vmatprep.mubr.msk.f32.mxu1 %vm95_vm0, %v85_v1  ;;  %v1958_v3 = vld [vmem:[%s2261_s3 + $0x20] sm:$0xff]  ;;  %1583 = vmatpush3.msra.mxu1 %v80_v0  ;;  %vm1036_vm4 = vcmask 1043456   ;;  %vm1031_vm5 = vcmask 1041409   ;;  %vm1033_vm6 = vcmask 31744   ;;  %s1411_s16 = sld [smem:[#allocation2]] }
  0x2e   :  { %1585 = vmatmul.mubr.msk.f32.vlgmr.msra.gmra.mxu1 %vm95_vm0, %v87_v2  ;;  %1587 = vmatprep.subr.mxu1 %v1871_v4  ;;  %v1462_v8 = vld [vmem:[%s2262_s4] ss:$0 sm:$0xff]  ;;  %s1873_s4 = smov 64   ;;  %s1486_s7 = sld [smem:[#allocation2 + $0x1]] }
  0x2f   :  { %1588 = vmatpush3.msra.mxu1 %v1958_v3  ;;  %1595 = vmatprep.mubr.msk.f32.mxu1 %vm1872_vm1, %v1871_v4 }
  0x30   :  { %1589 = vmatprep.subr.mxu1 %v1871_v4  ;;  %1599 = vmatpush3.msra.mxu0 %v1958_v3 }
  0x31   :  { %1590 = vmatpush3.msra.mxu1 %v1966_v5  ;;  %1600 = vmatprep.subr.mxu0 %v1871_v4 }
  0x32   :  { %1591 = vmatprep.subr.mxu1 %v1871_v4  ;;  %1601 = vmatpush3.msra.mxu0 %v1966_v5 }
  0x33   :  { %1592 = vmatpush3.msra.mxu1 %v1975_v6  ;;  %1602 = vmatprep.subr.mxu0 %v1871_v4  ;;  %s1412_s17 = sadd.s32 1, %s1411_s16 }
  0x34   :  { %1593 = vmatprep.subr.mxu1 %v1871_v4  ;;  %1603 = vmatpush3.msra.mxu0 %v1975_v6  ;;  %s1427_s18 = sadd.s32 1, %s1486_s7  ;;  %p1415_p1 = scmp.lt.s32.totalorder %s1412_s17, 8 }
  0x35   :  { %1594 = vmatpush3.msra.mxu1 %v1984_v7  ;;  %1604 = vmatprep.subr.mxu0 %v1871_v4  ;;  %p1430_p2 = scmp.lt.s32.totalorder %s1427_s18, 8 }
  0x36   :  { %1596 = vmatmul.mubr.f32.vlgmr.msra.gmra.mxu1 %v1871_v4  ;;  %1605 = vmatpush3.msra.mxu0 %v1984_v7 }
  0x37   :  { %1606 = vmatprep.mubr.msk.f32.mxu0 %vm1872_vm1, %v1871_v4  ;;  %1609 = vmatprep.subr.mxu1 %v1871_v4  ;;  %s1431_s19 = scalar_select %p1430_p2, 1, 0 }
  0x38   :  { %1610 = vmatpush3.msra.mxu1 %v1958_v3  ;;  %1617 = vmatprep.mubr.msk.f32.mxu1 %vm1872_vm1, %v1871_v4 }
  0x39   :  { %1611 = vmatprep.subr.mxu1 %v1871_v4  ;;  %1620 = vmatprep.subr.mxu0 %v1871_v4 }
  0x3a   :  { %1612 = vmatpush3.msra.mxu1 %v1966_v5 }
  0x3b   :  { %1613 = vmatprep.subr.mxu1 %v1871_v4 }
  0x3c   :  { %1614 = vmatpush3.msra.mxu1 %v1975_v6 }
  0x3d   :  { %1615 = vmatprep.subr.mxu1 %v1871_v4 }
  0x3e   :  { %1616 = vmatpush3.msra.mxu1 %v1984_v7 }
  0x3f   :  { %1631 = vmatprep.subr.mxu1 %v1871_v4 }
  0xee   :  { %v1586_v9 = vpop.f32.mrf.mxu1 }
  0xef   :  { %v174_v10 = vadd.f32 %v1586_v9, %v1462_v8 }
  0xf0   :  { %v168_v11 = vpop.f32.mrf.mxu1 }
  0xf1   :  { %v169_v12 = vadd.f32 %v1462_v8, %v168_v11  ;;  %v178_v13 = vrot.slane %v174_v10, 7  ;;  %v387_v14 = vrot.slane %v174_v10, 1  ;;  %v492_v15 = vrot.slane %v174_v10, 2 }
  0xf2   :  { %v597_v16 = vrot.slane %v174_v10, 3  ;;  %v702_v17 = vrot.slane %v174_v10, 4  ;;  %v807_v18 = vrot.slane %v174_v10, 5  ;;  %v912_v19 = vrot.slane %v174_v10, 6 }
  0xf3   :  { %v282_v20 = vrot.slane %v169_v12, 1  ;;  %v385_v21 = vrot.slane %v169_v12, 2  ;;  %v490_v22 = vrot.slane %v169_v12, 3  ;;  %v595_v23 = vrot.slane %v169_v12, 4 }
  0xf4   :  { %v700_v24 = vrot.slane %v169_v12, 5  ;;  %v805_v25 = vrot.slane %v169_v12, 6  ;;  %v910_v26 = vrot.slane %v169_v12, 7  ;;  %v181_v27 = vsel %vm180_vm2, %v169_v12, %v178_v13 }
  0xf5   :  { %v284_v28 = vsel %vm180_vm2, %v282_v20, %v174_v10  ;;  %v2015_v29 = vsel %vm180_vm2, %v385_v21, %v387_v14  ;;  %v2018_v30 = vsel %vm180_vm2, %v490_v22, %v492_v15  ;;  %v2021_v32 = vsel %vm180_vm2, %v595_v23, %v597_v16 }
  0xf6   :  { %v252_v31 = vpop.f32.mrf.mxu1  ;;  %v2024_v33 = vsel %vm180_vm2, %v700_v24, %v702_v17  ;;  %v2027_v34 = vsel %vm180_vm2, %v805_v25, %v807_v18  ;;  %v2030_v35 = vsel %vm180_vm2, %v910_v26, %v912_v19 }
  0xf7   :  { %v256_v36 = vadd.f32 %v252_v31, %v181_v27 }
  0xf8   :  { %v1597_v37 = vpop.f32.mrf.mxu1 }
  0xf9   :  { %1720 = vtanh.f32 %v256_v36  ;;  %v1465_v39 = vmul.f32 -1.442695, %v256_v36 }
  0xfb   :  { %1722 = vpow2.f32 %v1465_v39 }
 0x106   :  { %v1721_v38 = vpop.eup %1720 }
 0x107   :  { %266 = vrot.lane.b32.xlu0 %v1721_v38, %s1873_s4 }
 0x108   :  { %v1723_v40 = vpop.eup %1722 }
 0x109   :  { %v260_v41 = vadd.f32 1.0, %v1723_v40 }
 0x10b   :  { %1724 = vrcp.f32 %v260_v41 }
 0x118   :  { %v1725_v42 = vpop.eup %1724 }
 0x119   :  { %v264_v45 = vmul.f32 0.0, %v1725_v42 }
 0x179   :  { %v267_v43 = vpop.permute.xlu0 %266 }
 0x17a   :  { %v269_v44 = vmul.f32 %v1725_v42, %v267_v43 }
 0x17c   :  { %271 = vrot.lane.b32.xlu0 %v269_v44, %s1874_s23 }
 0x1ee   :  { %v272_v46 = vpop.permute.xlu0 %271 }
 0x1ef   :  { %v274_v47 = vadd.f32 %v272_v46, %v264_v45 }
 0x1f1   :  { %1726 = vtanh.f32 %v274_v47 }
 0x1fe   :  { %v1727_v48 = vpop.eup %1726 }
 0x1ff   :  { %277 = vrot.lane.b32.xlu1 %v1727_v48, %s1873_s4 }
 0x271   :  { %v278_v49 = vpop.permute.xlu1 %277 }
 0x272   :  { %v280_v50 = vmul.f32 %v1725_v42, %v278_v49 }
 0x274   :  { %286 = vrot.lane.b32.xlu1 %v280_v50, %s1874_s23 }
 0x2e6   :  { %v287_v51 = vpop.permute.xlu1 %286 }
 0x2e7   :  { %1607 = vmatmul.mubr.msk.f32.vlgmr.msra.gmra.mxu0 %vm182_vm3, %v287_v51 }
 0x2e8   :  { %1621 = vmatpush3.msra.mxu0 %v1958_v3  ;;  %1628 = vmatprep.mubr.msk.f32.mxu0 %vm1872_vm1, %v1871_v4 }
 0x2e9   :  { %1622 = vmatprep.subr.mxu0 %v1871_v4 }
 0x2ea   :  { %1623 = vmatpush3.msra.mxu0 %v1966_v5 }
 0x2eb   :  { %1624 = vmatprep.subr.mxu0 %v1871_v4 }
 0x2ec   :  { %1625 = vmatpush3.msra.mxu0 %v1975_v6 }
 0x2ed   :  { %1626 = vmatprep.subr.mxu0 %v1871_v4 }
 0x2ee   :  { %1627 = vmatpush3.msra.mxu0 %v1984_v7 }
 0x2ef   :  { %1642 = vmatprep.subr.mxu0 %v1871_v4 }
 0x3a7   :  { %v356_v52 = vpop.f32.mrf.mxu0 }
 0x3a8   :  { %v360_v53 = vadd.f32 %v356_v52, %v284_v28 }
 0x3a9   :  { %v1608_v54 = vpop.f32.mrf.mxu0 }
 0x3aa   :  { %1728 = vtanh.f32 %v360_v53  ;;  %v1467_v56 = vmul.f32 -1.442695, %v360_v53 }
 0x3ac   :  { %1730 = vpow2.f32 %v1467_v56 }
 0x3b7   :  { %v1729_v55 = vpop.eup %1728 }
 0x3b8   :  { %370 = vrot.lane.b32.xlu0 %v1729_v55, %s1873_s4 }
 0x3b9   :  { %v1731_v57 = vpop.eup %1730 }
 0x3ba   :  { %v364_v58 = vadd.f32 1.0, %v1731_v57 }
 0x3bc   :  { %1732 = vrcp.f32 %v364_v58 }
 0x3c9   :  { %v1733_v59 = vpop.eup %1732 }
 0x3ca   :  { %v368_v62 = vmul.f32 %v1733_v59, %v274_v47 }
 0x42a   :  { %v371_v60 = vpop.permute.xlu0 %370 }
 0x42b   :  { %v373_v61 = vmul.f32 %v1733_v59, %v371_v60 }
 0x42d   :  { %375 = vrot.lane.b32.xlu1 %v373_v61, %s1874_s23 }
 0x49f   :  { %v376_v63 = vpop.permute.xlu1 %375 }
 0x4a0   :  { %v378_v0 = vadd.f32 %v376_v63, %v368_v62 }
 0x4a2   :  { %1734 = vtanh.f32 %v378_v0 }
 0x4af   :  { %v1735_v1 = vpop.eup %1734 }
 0x4b0   :  { %381 = vrot.lane.b32.xlu0 %v1735_v1, %s1873_s4 }
 0x522   :  { %v382_v2 = vpop.permute.xlu0 %381 }
 0x523   :  { %v384_v8 = vmul.f32 %v1733_v59, %v382_v2 }
 0x525   :  { %391 = vrot.lane.b32.xlu1 %v384_v8, %s1874_s23 }
 0x597   :  { %v392_v9 = vpop.permute.xlu1 %391 }
 0x598   :  { %1618 = vmatmul.mubr.msk.f32.vlgmr.msra.gmra.mxu1 %vm182_vm3, %v392_v9 }
 0x599   :  { %1632 = vmatpush3.msra.mxu1 %v1958_v3  ;;  %1639 = vmatprep.mubr.msk.f32.mxu1 %vm1872_vm1, %v1871_v4 }
 0x59a   :  { %1633 = vmatprep.subr.mxu1 %v1871_v4 }
 0x59b   :  { %1634 = vmatpush3.msra.mxu1 %v1966_v5 }
 0x59c   :  { %1635 = vmatprep.subr.mxu1 %v1871_v4 }
 0x59d   :  { %1636 = vmatpush3.msra.mxu1 %v1975_v6 }
 0x59e   :  { %1637 = vmatprep.subr.mxu1 %v1871_v4 }
 0x59f   :  { %1638 = vmatpush3.msra.mxu1 %v1984_v7 }
 0x5a0   :  { %1653 = vmatprep.subr.mxu1 %v1871_v4 }
 0x658   :  { %v461_v10 = vpop.f32.mrf.mxu1 }
 0x659   :  { %v465_v11 = vadd.f32 %v461_v10, %v2015_v29 }
 0x65a   :  { %v1619_v12 = vpop.f32.mrf.mxu1 }
 0x65b   :  { %1736 = vtanh.f32 %v465_v11  ;;  %v1469_v14 = vmul.f32 -1.442695, %v465_v11 }
 0x65d   :  { %1738 = vpow2.f32 %v1469_v14 }
 0x668   :  { %v1737_v13 = vpop.eup %1736 }
 0x669   :  { %475 = vrot.lane.b32.xlu0 %v1737_v13, %s1873_s4 }
 0x66a   :  { %v1739_v15 = vpop.eup %1738 }
 0x66b   :  { %v469_v16 = vadd.f32 1.0, %v1739_v15 }
 0x66d   :  { %1740 = vrcp.f32 %v469_v16 }
 0x67a   :  { %v1741_v17 = vpop.eup %1740 }
 0x67b   :  { %v473_v20 = vmul.f32 %v1741_v17, %v378_v0 }
 0x6db   :  { %v476_v18 = vpop.permute.xlu0 %475 }
 0x6dc   :  { %v478_v19 = vmul.f32 %v1741_v17, %v476_v18 }
 0x6de   :  { %480 = vrot.lane.b32.xlu1 %v478_v19, %s1874_s23 }
 0x750   :  { %v481_v21 = vpop.permute.xlu1 %480 }
 0x751   :  { %v483_v22 = vadd.f32 %v481_v21, %v473_v20 }
 0x753   :  { %1742 = vtanh.f32 %v483_v22 }
 0x760   :  { %v1743_v23 = vpop.eup %1742 }
 0x761   :  { %486 = vrot.lane.b32.xlu0 %v1743_v23, %s1873_s4 }
 0x7d3   :  { %v487_v24 = vpop.permute.xlu0 %486 }
 0x7d4   :  { %v489_v25 = vmul.f32 %v1741_v17, %v487_v24 }
 0x7d6   :  { %496 = vrot.lane.b32.xlu1 %v489_v25, %s1874_s23 }
 0x848   :  { %v497_v26 = vpop.permute.xlu1 %496 }
 0x849   :  { %1629 = vmatmul.mubr.msk.f32.vlgmr.msra.gmra.mxu0 %vm182_vm3, %v497_v26 }
 0x84a   :  { %1643 = vmatpush3.msra.mxu0 %v1958_v3  ;;  %1650 = vmatprep.mubr.msk.f32.mxu0 %vm1872_vm1, %v1871_v4 }
 0x84b   :  { %1644 = vmatprep.subr.mxu0 %v1871_v4 }
 0x84c   :  { %1645 = vmatpush3.msra.mxu0 %v1966_v5 }
 0x84d   :  { %1646 = vmatprep.subr.mxu0 %v1871_v4 }
 0x84e   :  { %1647 = vmatpush3.msra.mxu0 %v1975_v6 }
 0x84f   :  { %1648 = vmatprep.subr.mxu0 %v1871_v4 }
 0x850   :  { %1649 = vmatpush3.msra.mxu0 %v1984_v7 }
 0x851   :  { %1664 = vmatprep.subr.mxu0 %v1871_v4 }
 0x909   :  { %v566_v27 = vpop.f32.mrf.mxu0 }
 0x90a   :  { %v570_v28 = vadd.f32 %v566_v27, %v2018_v30 }
 0x90b   :  { %v1630_v29 = vpop.f32.mrf.mxu0 }
 0x90c   :  { %1744 = vtanh.f32 %v570_v28  ;;  %v1471_v36 = vmul.f32 -1.442695, %v570_v28 }
 0x90e   :  { %1746 = vpow2.f32 %v1471_v36 }
 0x919   :  { %v1745_v31 = vpop.eup %1744 }
 0x91a   :  { %580 = vrot.lane.b32.xlu0 %v1745_v31, %s1873_s4 }
 0x91b   :  { %v1747_v37 = vpop.eup %1746 }
 0x91c   :  { %v574_v38 = vadd.f32 1.0, %v1747_v37 }
 0x91e   :  { %1748 = vrcp.f32 %v574_v38 }
 0x92b   :  { %v1749_v39 = vpop.eup %1748 }
 0x92c   :  { %v578_v42 = vmul.f32 %v1749_v39, %v483_v22 }
 0x98c   :  { %v581_v40 = vpop.permute.xlu0 %580 }
 0x98d   :  { %v583_v41 = vmul.f32 %v1749_v39, %v581_v40 }
 0x98f   :  { %585 = vrot.lane.b32.xlu1 %v583_v41, %s1874_s23 }
 0xa01   :  { %v586_v43 = vpop.permute.xlu1 %585 }
 0xa02   :  { %v588_v44 = vadd.f32 %v586_v43, %v578_v42 }
 0xa04   :  { %1750 = vtanh.f32 %v588_v44 }
 0xa11   :  { %v1751_v30 = vpop.eup %1750 }
 0xa12   :  { %591 = vrot.lane.b32.xlu0 %v1751_v30, %s1873_s4 }
 0xa84   :  { %v592_v45 = vpop.permute.xlu0 %591 }
 0xa85   :  { %v594_v46 = vmul.f32 %v1749_v39, %v592_v45 }
 0xa87   :  { %601 = vrot.lane.b32.xlu1 %v594_v46, %s1874_s23 }
 0xaf9   :  { %v602_v47 = vpop.permute.xlu1 %601 }
 0xafa   :  { %1640 = vmatmul.mubr.msk.f32.vlgmr.msra.gmra.mxu1 %vm182_vm3, %v602_v47 }
 0xafb   :  { %1654 = vmatpush3.msra.mxu1 %v1958_v3  ;;  %1661 = vmatprep.mubr.msk.f32.mxu1 %vm1872_vm1, %v1871_v4 }
 0xafc   :  { %1655 = vmatprep.subr.mxu1 %v1871_v4 }
 0xafd   :  { %1656 = vmatpush3.msra.mxu1 %v1966_v5 }
 0xafe   :  { %1657 = vmatprep.subr.mxu1 %v1871_v4 }
 0xaff   :  { %1658 = vmatpush3.msra.mxu1 %v1975_v6 }
 0xb00   :  { %1659 = vmatprep.subr.mxu1 %v1871_v4 }
 0xb01   :  { %1660 = vmatpush3.msra.mxu1 %v1984_v7 }
 0xbba   :  { %v671_v48 = vpop.f32.mrf.mxu1 }
 0xbbb   :  { %v675_v49 = vadd.f32 %v671_v48, %v2021_v32 }
 0xbbc   :  { %v1641_v50 = vpop.f32.mrf.mxu1 }
 0xbbd   :  { %1752 = vtanh.f32 %v675_v49  ;;  %v1473_v52 = vmul.f32 -1.442695, %v675_v49  ;;  %v1024_v49 = vld [vmem:[%s2263_s5 + $0x38] sm:$0xff]  ;;  %v1023_v50 = vld [vmem:[%s2263_s5 + $0x30] sm:$0xff] }
 0xbbf   :  { %1754 = vpow2.f32 %v1473_v52  ;;  %v1026_v52 = vld [vmem:[%s2263_s5 + $0x48] sm:$0xf] }
 0xbc0   :  { %1480 = vmatprep.subr.msk.mxu1 %vm1036_vm4, %v1026_v52 }
 0xbca   :  { %v1753_v51 = vpop.eup %1752 }
 0xbcb   :  { %685 = vrot.lane.b32.xlu0 %v1753_v51, %s1873_s4  ;;  %v1022_v51 = vld [vmem:[%s2263_s5 + $0x28] sm:$0xff] }
 0xbcc   :  { %v1755_v53 = vpop.eup %1754 }
 0xbcd   :  { %v679_v54 = vadd.f32 1.0, %v1755_v53  ;;  %v1021_v53 = vld [vmem:[%s2263_s5 + $0x20] sm:$0xff] }
 0xbcf   :  { %1756 = vrcp.f32 %v679_v54  ;;  %v1025_v54 = vld [vmem:[%s2263_s5 + $0x40] sm:$0xf] }
 0xbdc   :  { %v1757_v55 = vpop.eup %1756 }
 0xbdd   :  { %v683_v58 = vmul.f32 %v1757_v55, %v588_v44 }
 0xc3d   :  { %v686_v56 = vpop.permute.xlu0 %685 }
 0xc3e   :  { %v688_v57 = vmul.f32 %v1757_v55, %v686_v56  ;;  %v1015_v56 = vld [vmem:[%s2260_s2] sm:$0xff] }
 0xc40   :  { %690 = vrot.lane.b32.xlu1 %v688_v57, %s1874_s23  ;;  %v1019_v57 = vld [vmem:[%s2263_s5 + $0x10] sm:$0xff] }
 0xcb2   :  { %v691_v59 = vpop.permute.xlu1 %690 }
 0xcb3   :  { %v693_v60 = vadd.f32 %v691_v59, %v683_v58  ;;  %v1016_v58 = vld [vmem:[%s2260_s2 + $0x8] sm:$0xff]  ;;  %v1029_v59 = vrot.slane %v1015_v56, 7 }
 0xcb5   :  { %1758 = vtanh.f32 %v693_v60 }
 0xcc2   :  { %v1759_v32 = vpop.eup %1758 }
 0xcc3   :  { %696 = vrot.lane.b32.xlu0 %v1759_v32, %s1873_s4  ;;  %v1018_v32 = vld [vmem:[%s2263_s5 + $0x8] sm:$0xff] }
 0xd35   :  { %v697_v61 = vpop.permute.xlu0 %696 }
 0xd36   :  { %v699_v62 = vmul.f32 %v1757_v55, %v697_v61  ;;  %v1020_v55 = vld [vmem:[%s2263_s5 + $0x18] sm:$0xff]  ;;  %v1017_v61 = vld [vmem:[%s2263_s5] sm:$0xff] }
 0xd38   :  { %706 = vrot.lane.b32.xlu1 %v699_v62, %s1874_s23 }
 0xdaa   :  { %v707_v63 = vpop.permute.xlu1 %706 }
 0xdab   :  { %1651 = vmatmul.mubr.msk.f32.vlgmr.msra.gmra.mxu0 %vm182_vm3, %v707_v63 }
 0xdac   :  { %1665 = vmatpush3.msra.mxu0 %v1958_v3  ;;  %1672 = vmatprep.mubr.msk.f32.mxu0 %vm1872_vm1, %v1871_v4 }
 0xdad   :  { %1666 = vmatprep.subr.mxu0 %v1871_v4 }
 0xdae   :  { %1667 = vmatpush3.msra.mxu0 %v1966_v5 }
 0xdaf   :  { %1668 = vmatprep.subr.mxu0 %v1871_v4 }
 0xdb0   :  { %1669 = vmatpush3.msra.mxu0 %v1975_v6 }
 0xdb1   :  { %1670 = vmatprep.subr.mxu0 %v1871_v4 }
 0xdb2   :  { %1671 = vmatpush3.msra.mxu0 %v1984_v7 }
 0xdb3   :  { %1143 = vmatprep.subr.mxu0 %v1024_v49 }
 0xe6b   :  { %v776_v0 = vpop.f32.mrf.mxu0 }
 0xe6c   :  { %v780_v1 = vadd.f32 %v776_v0, %v2024_v33  ;;  %v1237_v0 = vld [vmem:[#allocation7 + $0xf8] sm:$0xff] }
 0xe6d   :  { %v1652_v2 = vpop.f32.mrf.mxu0 }
 0xe6e   :  { %1760 = vtanh.f32 %v780_v1  ;;  %v1475_v8 = vmul.f32 -1.442695, %v780_v1  ;;  %v1221_v1 = vld [vmem:[#allocation7 + $0x78] sm:$0xff]  ;;  %v1236_v2 = vld [vmem:[#allocation7 + $0xf0] sm:$0xff] }
 0xe70   :  { %1762 = vpow2.f32 %v1475_v8  ;;  %v1235_v8 = vld [vmem:[#allocation7 + $0xe8] sm:$0xff] }
 0xe7b   :  { %v1761_v3 = vpop.eup %1760 }
 0xe7c   :  { %790 = vrot.lane.b32.xlu0 %v1761_v3, %s1873_s4  ;;  %v1220_v3 = vld [vmem:[#allocation7 + $0x70] sm:$0xff] }
 0xe7d   :  { %v1763_v9 = vpop.eup %1762 }
 0xe7e   :  { %v784_v5 = vadd.f32 1.0, %v1763_v9  ;;  %v1219_v9 = vld [vmem:[#allocation7 + $0x68] sm:$0xff] }
 0xe80   :  { %1764 = vrcp.f32 %v784_v5  ;;  %v1234_v5 = vld [vmem:[#allocation7 + $0xe0] sm:$0xff] }
 0xe8d   :  { %v1765_v10 = vpop.eup %1764 }
 0xe8e   :  { %v788_v12 = vmul.f32 %v1765_v10, %v693_v60  ;;  %v1030_v60 = vrot.slane %v1016_v58, 6 }
 0xe90   :  { %v1032_v62 = vsel %vm1031_vm5, %v1030_v60, %v1029_v59 }
 0xeee   :  { %v791_v11 = vpop.permute.xlu0 %790 }
 0xeef   :  { %v793_v6 = vmul.f32 %v1765_v10, %v791_v11  ;;  %v1233_v11 = vld [vmem:[#allocation7 + $0xd8] sm:$0xff] }
 0xef1   :  { %795 = vrot.lane.b32.xlu1 %v793_v6, %s1874_s23  ;;  %v1217_v6 = vld [vmem:[#allocation7 + $0x58] sm:$0xff] }
 0xf63   :  { %v796_v7 = vpop.permute.xlu1 %795 }
 0xf64   :  { %v798_v13 = vadd.f32 %v796_v7, %v788_v12  ;;  %v1232_v12 = vld [vmem:[#allocation7 + $0xd0] sm:$0xff] }
 0xf65   :  { %v1216_v7 = vld [vmem:[#allocation7 + $0x50] sm:$0xff] }
 0xf66   :  { %1766 = vtanh.f32 %v798_v13 }
 0xf73   :  { %v1767_v33 = vpop.eup %1766 }
 0xf74   :  { %801 = vrot.lane.b32.xlu0 %v1767_v33, %s1873_s4  ;;  %v1231_v33 = vld [vmem:[#allocation7 + $0xc8] sm:$0xff] }
 0xfe6   :  { %v802_v14 = vpop.permute.xlu0 %801 }
 0xfe7   :  { %v804_v15 = vmul.f32 %v1765_v10, %v802_v14  ;;  %v1218_v10 = vld [vmem:[#allocation7 + $0x60] sm:$0xff] }
 0xfe9   :  { %811 = vrot.lane.b32.xlu1 %v804_v15, %s1874_s23  ;;  %v1215_v15 = vld [vmem:[#allocation7 + $0x48] sm:$0xff] }
0x105b   :  { %v812_v16 = vpop.permute.xlu1 %811 }
0x105c   :  { %1662 = vmatmul.mubr.msk.f32.vlgmr.msra.gmra.mxu1 %vm182_vm3, %v812_v16  ;;  %v1230_v16 = vld [vmem:[#allocation7 + $0xc0] sm:$0xff] }
0x105d   :  { %1107 = vmatprep.mubr.f32.mxu1 %v1871_v4  ;;  %1481 = vmatpush1.msk.msra.mxu1 %vm1036_vm4, %v1025_v54 }
0x105e   :  { %1530 = vmatprep.subr.mxu1 %v1237_v0  ;;  %v1320_v0 = vld [vmem:[%s2267_s9 + $0x20] sm:$0xff] }
0x1060   :  { %1482 = vmatmul.mubr.msk.f32.vlgmr.msra.gmra.mxu1 %vm1033_vm6, %v1032_v62 }
0x1061   :  { %1531 = vmatpush3.msra.mxu1 %v1221_v1  ;;  %v1319_v1 = vld [vmem:[%s2267_s9 + $0x18] sm:$0xff] }
0x1062   :  { %1532 = vmatprep.subr.mxu1 %v1236_v2  ;;  %v1318_v2 = vld [vmem:[%s2267_s9 + $0x10] sm:$0xff] }
0x1063   :  { %1533 = vmatpush3.msra.mxu1 %v1220_v3  ;;  %v1317_v3 = vld [vmem:[%s2267_s9 + $0x8] sm:$0xff] }
0x1064   :  { %1534 = vmatprep.subr.mxu1 %v1235_v8  ;;  %v1316_v8 = vld [vmem:[%s2267_s9] sm:$0xff] }
0x1065   :  { %1535 = vmatpush3.msra.mxu1 %v1219_v9 }
0x1066   :  { %1536 = vmatprep.subr.mxu1 %v1234_v5  ;;  %v1484_v5 = vld [vmem:[%s2266_s8] ss:$0 sm:$0xff]  ;;  %s1875_s8 = smov [#allocation9]  }
0x1067   :  { %1537 = vmatpush3.msra.mxu1 %v1218_v10  ;;  %s1448_s3 = sshll.u32 %s1875_s8, 4  ;;  %s1449_s3 = int_to_ptr.vmem [resolvable:$true] %s1448_s3 }
0x1068   :  { %1538 = vmatprep.subr.mxu1 %v1233_v11  ;;  %p1843_p4 = scmp.lt.s32.totalorder %s1449_s3, %s1449_s3 }
0x1069   :  { %1539 = vmatpush3.msra.mxu1 %v1217_v6 }
0x106a   :  { %1540 = vmatprep.subr.mxu1 %v1232_v12 }
0x106b   :  { %1541 = vmatpush3.msra.mxu1 %v1216_v7 }
0x106c   :  { %1542 = vmatprep.subr.mxu1 %v1231_v33  ;;  %v1432_v33 = vstv %s1431_s19 }
0x106d   :  { %1543 = vmatpush3.msra.mxu1 %v1215_v15  ;;  %vm1433_vm10 = vcmp.eq.s32.totalorder %v1432_v33, 1 }
0x106e   :  { %1544 = vmatprep.subr.mxu1 %v1230_v16 }
0x111c   :  { %v881_v17 = vpop.f32.mrf.mxu1 }
0x111d   :  { %v885_v18 = vadd.f32 %v881_v17, %v2027_v34  ;;  %v1214_v17 = vld [vmem:[#allocation7 + $0x40] sm:$0xff] }
0x111e   :  { %v1663_v19 = vpop.f32.mrf.mxu1  ;;  %1545 = vmatpush3.msra.mxu1 %v1214_v17 }
0x111f   :  { %1768 = vtanh.f32 %v885_v18  ;;  %v1477_v21 = vmul.f32 -1.442695, %v885_v18  ;;  %v1229_v18 = vld [vmem:[#allocation7 + $0xb8] sm:$0xff] }
0x1120   :  { %v1213_v19 = vld [vmem:[#allocation7 + $0x38] sm:$0xff]  ;;  %1546 = vmatprep.subr.mxu1 %v1229_v18 }
0x1121   :  { %1770 = vpow2.f32 %v1477_v21  ;;  %v1212_v21 = vld [vmem:[#allocation7 + $0x30] sm:$0xff]  ;;  %1547 = vmatpush3.msra.mxu1 %v1213_v19 }
0x112c   :  { %v1769_v20 = vpop.eup %1768 }
0x112d   :  { %895 = vrot.lane.b32.xlu0 %v1769_v20, %s1873_s4  ;;  %v1228_v20 = vld [vmem:[#allocation7 + $0xb0] sm:$0xff] }
0x112e   :  { %v1771_v22 = vpop.eup %1770  ;;  %1548 = vmatprep.subr.mxu1 %v1228_v20  ;;  %v1784_v20 = vld [vmem:[#allocation6] sm:$0xff] }
0x112f   :  { %v889_v23 = vadd.f32 1.0, %v1771_v22  ;;  %v1227_v22 = vld [vmem:[#allocation7 + $0xa8] sm:$0xff]  ;;  %1549 = vmatpush3.msra.mxu1 %v1212_v21 }
0x1130   :  { %1550 = vmatprep.subr.mxu1 %v1227_v22  ;;  %v1785_v22 = vld [vmem:[#allocation6 + $0x8] sm:$0xff] }
0x1131   :  { %1772 = vrcp.f32 %v889_v23  ;;  %v1211_v23 = vld [vmem:[#allocation7 + $0x28] sm:$0xff] }
0x1132   :  { %1551 = vmatpush3.msra.mxu1 %v1211_v23 }
0x113e   :  { %v1773_v24 = vpop.eup %1772 }
0x113f   :  { %v893_v27 = vmul.f32 %v1773_v24, %v798_v13 }
0x119f   :  { %v896_v25 = vpop.permute.xlu0 %895 }
0x11a0   :  { %v898_v26 = vmul.f32 %v1773_v24, %v896_v25  ;;  %v1226_v25 = vld [vmem:[#allocation7 + $0xa0] sm:$0xff] }
0x11a1   :  { %1552 = vmatprep.subr.mxu1 %v1226_v25 }
0x11a2   :  { %900 = vrot.lane.b32.xlu1 %v898_v26, %s1874_s23  ;;  %v1210_v26 = vld [vmem:[#allocation7 + $0x20] sm:$0xff] }
0x11a3   :  { %1553 = vmatpush3.msra.mxu1 %v1210_v26 }
0x1214   :  { %v901_v28 = vpop.permute.xlu1 %900 }
0x1215   :  { %v903_v29 = vadd.f32 %v901_v28, %v893_v27  ;;  %v1225_v27 = vld [vmem:[#allocation7 + $0x98] sm:$0xff] }
0x1216   :  { %1554 = vmatprep.subr.mxu1 %v1225_v27  ;;  %v1209_v28 = vld [vmem:[#allocation7 + $0x18] sm:$0xff] }
0x1217   :  { %1774 = vtanh.f32 %v903_v29  ;;  %1555 = vmatpush3.msra.mxu1 %v1209_v28 }
0x1224   :  { %v1775_v34 = vpop.eup %1774 }
0x1225   :  { %906 = vrot.lane.b32.xlu0 %v1775_v34, %s1873_s4  ;;  %v1208_v34 = vld [vmem:[#allocation7 + $0x10] sm:$0xff] }
0x1297   :  { %v907_v31 = vpop.permute.xlu0 %906 }
0x1298   :  { %v909_v36 = vmul.f32 %v1773_v24, %v907_v31  ;;  %v1223_v31 = vld [vmem:[#allocation7 + $0x88] sm:$0xff] }
0x129a   :  { %916 = vrot.lane.b32.xlu1 %v909_v36, %s1874_s23  ;;  %v1207_v36 = vld [vmem:[#allocation7 + $0x8] sm:$0xff] }
0x130c   :  { %v917_v37 = vpop.permute.xlu1 %916 }
0x130d   :  { %1673 = vmatmul.mubr.msk.f32.vlgmr.msra.gmra.mxu0 %vm182_vm3, %v917_v37  ;;  %v1222_v37 = vld [vmem:[#allocation7 + $0x80] sm:$0xff] }
0x130e   :  { %1183 = vmatprep.mubr.f32.mxu0 %v1871_v4  ;;  %1144 = vmatpush1.msra.mxu0 %v1023_v50 }
0x130f   :  { %1145 = vmatprep.subr.mxu0 %v1022_v51  ;;  %v1190_v51 = vld [vmem:[%s2264_s6] sm:$0x3] }
0x1310   :  { %1146 = vmatpush1.msra.mxu0 %v1021_v53  ;;  %v1109_v53 = vpop.f32.mrf.mxu1 }
0x1311   :  { %1147 = vmatprep.subr.mxu0 %v1020_v55 }
0x1312   :  { %1148 = vmatpush1.msra.mxu0 %v1019_v57  ;;  %v1111_v58 = vpop.f32.mrf.mxu1 }
0x1313   :  { %1149 = vmatprep.subr.mxu0 %v1018_v32 }
0x1314   :  { %1150 = vmatpush1.msra.mxu0 %v1017_v61 }
0x1315   :  { %1675 = vmatprep.subr.mxu0 %v1871_v4 }
0x13cd   :  { %v986_v38 = vpop.f32.mrf.mxu0 }
0x13ce   :  { %v990_v39 = vadd.f32 %v986_v38, %v2030_v35  ;;  %v1206_v38 = vld [vmem:[#allocation7] sm:$0xff] }
0x13cf   :  { %v1674_v40 = vpop.f32.mrf.mxu0 }
0x13d0   :  { %1776 = vtanh.f32 %v990_v39  ;;  %v1479_v42 = vmul.f32 -1.442695, %v990_v39  ;;  %v1331_v39 = vld [vmem:[%s2267_s9 + $0x78] sm:$0xff]  ;;  %v1330_v40 = vld [vmem:[%s2267_s9 + $0x70] sm:$0xff] }
0x13d2   :  { %1778 = vpow2.f32 %v1479_v42  ;;  %v1328_v42 = vld [vmem:[%s2267_s9 + $0x60] sm:$0xff] }
0x13dd   :  { %v1777_v41 = vpop.eup %1776 }
0x13de   :  { %1000 = vrot.lane.b32.xlu0 %v1777_v41, %s1873_s4  ;;  %v1329_v41 = vld [vmem:[%s2267_s9 + $0x68] sm:$0xff] }
0x13df   :  { %v1779_v43 = vpop.eup %1778 }
0x13e0   :  { %v994_v44 = vadd.f32 1.0, %v1779_v43  ;;  %v1327_v43 = vld [vmem:[%s2267_s9 + $0x58] sm:$0xff] }
0x13e2   :  { %1780 = vrcp.f32 %v994_v44  ;;  %v1326_v44 = vld [vmem:[%s2267_s9 + $0x50] sm:$0xff] }
0x13ef   :  { %v2124_v30 = vpop.eup %1780 }
0x13f0   :  { %v998_v47 = vmul.f32 %v2124_v30, %v903_v29  ;;  %v1224_v29 = vld [vmem:[#allocation7 + $0x90] sm:$0xff] }
0x13f1   :  { %1556 = vmatprep.subr.mxu1 %v1224_v29 }
0x13f2   :  { %1557 = vmatpush3.msra.mxu1 %v1208_v34 }
0x13f3   :  { %1558 = vmatprep.subr.mxu1 %v1223_v31 }
0x13f4   :  { %1559 = vmatpush3.msra.mxu1 %v1207_v36 }
0x13f5   :  { %1560 = vmatprep.subr.mxu1 %v1222_v37 }
0x13f6   :  { %1561 = vmatpush3.msra.mxu1 %v1206_v38 }
0x1450   :  { %v1001_v45 = vpop.permute.xlu0 %1000 }
0x1451   :  { %v1003_v46 = vmul.f32 %v2124_v30, %v1001_v45  ;;  %v1324_v45 = vld [vmem:[%s2267_s9 + $0x40] sm:$0xff] }
0x1453   :  { %1005 = vrot.lane.b32.xlu1 %v1003_v46, %s1874_s23  ;;  %v1323_v46 = vld [vmem:[%s2267_s9 + $0x38] sm:$0xff] }
0x14c5   :  { %v1006_v35 = vpop.permute.xlu1 %1005 }
0x14c6   :  { %v1008_v48 = vadd.f32 %v1006_v35, %v998_v47  ;;  %v1322_v47 = vld [vmem:[%s2267_s9 + $0x30] sm:$0xff]  ;;  %v1321_v35 = vld [vmem:[%s2267_s9 + $0x28] sm:$0xff] }
0x14c8   :  { %1782 = vtanh.f32 %v1008_v48  ;;  %v1192_v48 = vlaneseq }
0x14ca   :  { %v2216_v49 = vshrl.u32 %v1192_v48, 7 }
0x14cc   :  { %v1194_v50 = vsub.s32 0, %v2216_v49  ;;  %v1198_v52 = vsub.s32 1, %v2216_v49 }
0x14ce   :  { %v1195_v55 = vrot.slane %v1190_v51, %v1194_v50  ;;  %v1199_v57 = vrot.slane %v1190_v51, %v1198_v52 }
0x14d5   :  { %v1783_v63 = vpop.eup %1782 }
0x14d6   :  { %1011 = vrot.lane.b32.xlu0 %v1783_v63, %s1873_s4 }
0x1548   :  { %v1012_v13 = vpop.permute.xlu0 %1011 }
0x1549   :  { %v1014_v14 = vmul.f32 %v2124_v30, %v1012_v13  ;;  %v1325_v30 = vld [vmem:[%s2267_s9 + $0x48] sm:$0xff]  ;;  %s1416_s9 = scalar_select %p1415_p1, 1, 0  ;;  %v1428_v13 = vstv %s1427_s18 }
0x154a   :  { %vm1429_vm9 = vcmp.eq.s32.totalorder %v2216_v49, %v1428_v13 }
0x154b   :  { %1115 = vrot.lane.b32.xlu1 %v1014_v14, %s1874_s23  ;;  %v1417_v7 = vstv %s1416_s9  ;;  %v1485_v14 = vld [vmem:[%s2268_s10] ss:$0 sm:$0xff]  ;;  %vm1434_vm12 = vmand %vm1429_vm9, %vm1433_vm10  ;;  %s1838_s10 = scalar_lea.vmem %s1449_s3, 256 }
0x154c   :  { %vm1418_vm8 = vcmp.eq.s32.totalorder %v1417_v7, 1  ;;  %p1839_p3 = scmp.ne.s32.totalorder %s1449_s3, %s1838_s10  ;;  %p1844_p5 = scmp.lt.s32.totalorder %s1838_s10, %s1838_s10 }
0x154e   :  { %p1845_p6 = por %p1844_p5, %p1843_p4 }
0x1550   :  { %p1846_p7 = pnand %p1845_p6, %p1839_p3 }
0x15bd   :  { %v1116_v24 = vpop.permute.xlu1 %1115 }
0x15be   :  { %1483 = vmatmul.mubr.msk.f32.vlgmr.msra.gmra.mxu0 %vm182_vm3, %v1116_v24 }
0x15bf   :  { %1707 = vmatprep.mubr.msk.f32.mxu0 %vm1872_vm1, %v1871_v4  ;;  %1676 = vmatpush3.msra.mxu0 %v1331_v39 }
0x15c0   :  { %1677 = vmatprep.subr.mxu0 %v1871_v4 }
0x15c1   :  { %1678 = vmatpush3.msra.mxu0 %v1330_v40 }
0x15c2   :  { %1679 = vmatprep.subr.mxu0 %v1871_v4 }
0x15c3   :  { %1680 = vmatpush3.msra.mxu0 %v1329_v41 }
0x15c4   :  { %1681 = vmatprep.subr.mxu0 %v1871_v4 }
0x15c5   :  { %1682 = vmatpush3.msra.mxu0 %v1328_v42 }
0x15c6   :  { %1683 = vmatprep.subr.mxu0 %v1871_v4 }
0x15c7   :  { %1684 = vmatpush3.msra.mxu0 %v1327_v43 }
0x15c8   :  { %1685 = vmatprep.subr.mxu0 %v1871_v4 }
0x15c9   :  { %1686 = vmatpush3.msra.mxu0 %v1326_v44 }
0x15ca   :  { %1687 = vmatprep.subr.mxu0 %v1871_v4 }
0x15cb   :  { %1688 = vmatpush3.msra.mxu0 %v1325_v30 }
0x15cc   :  { %1689 = vmatprep.subr.mxu0 %v1871_v4 }
0x15cd   :  { %1690 = vmatpush3.msra.mxu0 %v1324_v45 }
0x15ce   :  { %1691 = vmatprep.subr.mxu0 %v1871_v4 }
0x15cf   :  { %1692 = vmatpush3.msra.mxu0 %v1323_v46 }
0x15d0   :  { %1693 = vmatprep.subr.mxu0 %v1871_v4 }
0x15d1   :  { %1694 = vmatpush3.msra.mxu0 %v1322_v47 }
0x15d2   :  { %1695 = vmatprep.subr.mxu0 %v1871_v4 }
0x15d3   :  { %1696 = vmatpush3.msra.mxu0 %v1321_v35 }
0x15d4   :  { %1697 = vmatprep.subr.mxu0 %v1871_v4 }
0x15d5   :  { %1698 = vmatpush3.msra.mxu0 %v1320_v0 }
0x15d6   :  { %1699 = vmatprep.subr.mxu0 %v1871_v4 }
0x15d7   :  { %1700 = vmatpush3.msra.mxu0 %v1319_v1 }
0x15d8   :  { %1701 = vmatprep.subr.mxu0 %v1871_v4 }
0x15d9   :  { %1702 = vmatpush3.msra.mxu0 %v1318_v2 }
0x15da   :  { %1703 = vmatprep.subr.mxu0 %v1871_v4 }
0x15db   :  { %1704 = vmatpush3.msra.mxu0 %v1317_v3 }
0x15dc   :  { %1705 = vmatprep.subr.mxu0 %v1871_v4  ;;  %v1413_v4 = vstv %s1412_s17 }
0x15dd   :  { %1706 = vmatpush3.msra.mxu0 %v1316_v8  ;;  %vm1414_vm7 = vcmp.eq.s32.totalorder %v2216_v49, %v1413_v4 }
0x15de   :  { %vm1419_vm11 = vmand %vm1414_vm7, %vm1418_vm8 }
0x167e   :  { %v1185_v54 = vpop.f32.mrf.mxu0 }
0x167f   :  { %v1186_v56 = vadd.f32 %v1185_v54, %v1109_v53 }
0x1680   :  { %v1187_v59 = vpop.f32.mrf.mxu0 }
0x1681   :  { %v1188_v60 = vadd.f32 %v1187_v59, %v1111_v58  ;;  %v1202_v32 = vadd.f32 %v1195_v55, %v1186_v56 }
0x1683   :  { %v1203_v61 = vadd.f32 %v1199_v57, %v1188_v60  ;;  %v1204_v63 = vmax.f32 %v1202_v32, 0.0 }
0x1685   :  { %v1205_v62 = vmax.f32 %v1203_v61, 0.0 }
0x1687   :  { %1309 = vmatprep.mubr.f32.mxu1 %v1205_v62 }
0x1688   :  { %1310 = vmatmul.mubr.f32.vlgmr.msra.gmra.mxu1 %v1204_v63 }
0x1748   :  { %v1562_v9 = vpop.f32.mrf.mxu1 }
0x174a   :  { %v1563_v10 = vpop.f32.mrf.mxu1 }
0x174b   :  { %v1564_v11 = vadd.f32 %v1563_v10, %v1562_v9 }
0x174d   :  { %v1312_v6 = vadd.f32 %v1564_v11, %v1484_v5 }
0x174f   :  { %v1315_v12 = vmax.f32 %v1312_v6, 0.0 }
0x1751   :  { %1708 = vmatmul.mubr.f32.vlgmr.msra.gmra.mxu0 %v1315_v12 }
0x1811   :  { %v1405_v15 = vpop.f32.mrf.mxu0 }
0x1812   :  { %v1406_v16 = vadd.f32 %v1485_v14, %v1405_v15 }
0x1813   :  { %v1709_v17 = vpop.f32.mrf.mxu0 }
0x1814   :  { %v1423_v18 = vrot.slane %v1406_v16, %v1194_v50  ;;  %v1439_v19 = vrot.slane %v1406_v16, %v1198_v52 }
0x1816   :  { %v1424_v21 = vsel %vm1419_vm11, %v1423_v18, %v1784_v20  ;;  %v1440_v23 = vsel %vm1434_vm12, %v1439_v19, %v1785_v22 }
0x1817   :  { %1425 = vst.msk [vmem:[#allocation9] sm:$0xff] %vm95_vm0, %v1424_v21  ;;  %1442 = vst.msk [vmem:[#allocation9 + $0x8] sm:$0xff] %vm95_vm0, %v1440_v23 }
0x1818   :  { %1849 = shalt.err (!%p1846_p7)
}
0x1819   :  { %1454 = dma.vmem_to_hbm [thread:$0]  %s1449_s3, 256, %s2269_s11, [#allocation4], %s1868_s0, %s1868_s0, %s1869_s25  }
0x181a   :  { %1864 = dma.done.wait [#allocation4], 256  }
0x181b   :  { %1865 = vsyncadd [#allocation4], 4294967040 }
0x181c   :  { %1458 = vsyncpa [#allocation3], 1 }
0x181d   :  { %1459 = vsyncpa [#allocation8], 1 }
0x181e   :  { %1460 = vsyncpa [#allocation4], 1 }
0x181f   :  { %1461 = vsyncpa [#allocation5], 1 }

</bundles_post_ra>
